<compile_context>
chip_gen: v5e
topology: v5e:2x2
jax: 0.10.0
libtpu: 0.0.40
codegen_flags: <defaults>
</compile_context>

<pallas_src>
import functools

import jax
import jax.numpy as jnp
from jax import lax
from jax.experimental import pallas as pl
from jax.experimental.pallas import tpu as pltpu

EPS = 1e-5
LANE = 128             # lane width (last dim)
BF16_SUBLANE = 16      # bf16 packs 16 sublanes per vreg
FUSED_MAX_ROWS = 1024  # up to this many padded rows -> single VMEM-resident kernel
TILE_ROWS = 512        # batch tile for the tiled path (>=256 rows for MXU M; v7x-VMEM safe)
VMEM_LIMIT = 32 * 1024 * 1024


def _round_up(n, m):
    return ((n + m - 1) // m) * m


def _col_stats(h):
    """Column sum and sum-of-squares of an f32 (rows, H) tile -> ((1,H), (1,H)).

    For large tiles the axis-0 reduction is routed through the MXU (which has
    slack in this kernel) rather than the XLU: s = ones @ h.  An 8-row ones
    operand keeps the LHS sublane-aligned; row 0 of the result is used.
    """
    rows = h.shape[0]
    if rows >= 256:
        ones = jnp.ones((8, rows), jnp.float32)
        s = jnp.dot(ones, h, preferred_element_type=jnp.float32)[0:1]
        ss = jnp.dot(ones, h * h, preferred_element_type=jnp.float32)[0:1]
    else:
        s = jnp.sum(h, axis=0, keepdims=True)
        ss = jnp.sum(h * h, axis=0, keepdims=True)
    return s, ss


# --------------------------------------------------------------------------
# Fused path: whole (padded) batch in one VMEM-resident kernel (small batches)
# --------------------------------------------------------------------------
def _fused_mlp_kernel(x_ref, w1_ref, w2_ref, w3_ref, vec_ref, out_ref, *,
                      n_valid, h1, h2, n_pad):
    rows = x_ref.shape[0]
    pad = rows - n_valid          # zero-padded batch rows (static Python int)
    inv_n = jnp.float32(1.0 / n_valid)

    g1, be1 = vec_ref[0:1, :h1], vec_ref[1:2, :h1]
    g2, be2 = vec_ref[2:3, :h2], vec_ref[3:4, :h2]
    b3 = vec_ref[4:5, :n_pad]

    # ---- layer 1: Linear (bias dropped: dead under BN) -> BN(batch) -> ReLU ----
    hh = jnp.dot(x_ref[...], w1_ref[...], preferred_element_type=jnp.float32)
    # zero-padded x rows give exactly-zero h rows -> stats need no mask
    s, ss = _col_stats(hh)
    mu = s * inv_n
    var = ss * inv_n - mu * mu
    scale = lax.rsqrt(var + EPS) * g1
    shift = be1 - mu * scale
    a = jnp.maximum(hh * scale + shift, 0.0)

    # ---- layer 2 ----
    hh = jnp.dot(a.astype(jnp.bfloat16), w2_ref[...],
                 preferred_element_type=jnp.float32)
    s, ss = _col_stats(hh)
    if pad:
        # All padded rows of hh are one identical constant row; subtract its
        # contribution from the sums (exact) instead of masking the whole tile.
        d = hh[rows - 1:rows, :]
        s = s - pad * d
        ss = ss - pad * (d * d)
    mu = s * inv_n
    var = ss * inv_n - mu * mu
    scale = lax.rsqrt(var + EPS) * g2
    shift = be2 - mu * scale
    a = jnp.maximum(hh * scale + shift, 0.0)

    # ---- output head (lane-dense padded N, unmasked stores) ----
    out = jnp.dot(a.astype(jnp.bfloat16), w3_ref[...],
                  preferred_element_type=jnp.float32) + b3
    out_ref[...] = out.astype(out_ref.dtype)


def _fused_forward(x, params, b_valid):
    in_features = x.shape[1]
    h1 = params["w1"].shape[1]
    h2 = params["w2"].shape[1]
    num_classes = params["w3"].shape[1]
    assert h1 % LANE == 0 and h2 % LANE == 0, "hidden sizes must be lane-aligned"

    k_pad = _round_up(in_features, LANE)
    n_pad = _round_up(num_classes, LANE)
    b_pad = _round_up(b_valid, BF16_SUBLANE)
    h_max = max(h1, h2, n_pad)

    x_p = jnp.pad(x, ((0, b_pad - b_valid), (0, k_pad - in_features))).astype(jnp.bfloat16)
    w1 = jnp.pad(params["w1"], ((0, k_pad - in_features), (0, 0))).astype(jnp.bfloat16)
    w2 = params["w2"].astype(jnp.bfloat16)
    w3 = jnp.pad(params["w3"], ((0, 0), (0, n_pad - num_classes))).astype(jnp.bfloat16)

    def row(v):
        return jnp.pad(v, ((0, 0), (0, h_max - v.shape[1])))

    # One packed f32 vector tile: [g1; be1; g2; be2; b3]
    vec = jnp.concatenate(
        [row(params["g1"]), row(params["be1"]),
         row(params["g2"]), row(params["be2"]), row(params["b3"])], axis=0)

    kernel = functools.partial(_fused_mlp_kernel, n_valid=b_valid,
                               h1=h1, h2=h2, n_pad=n_pad)
    vmem = pl.BlockSpec(memory_space=pltpu.MemorySpace.VMEM)
    out_p = pl.pallas_call(
        kernel,
        out_shape=jax.ShapeDtypeStruct((b_pad, n_pad), jnp.float32),
        in_specs=[vmem] * 5,
        out_specs=vmem,
        compiler_params=pltpu.CompilerParams(vmem_limit_bytes=VMEM_LIMIT),
    )(x_p, w1, w2, w3, vec)
    return out_p[:b_valid, :num_classes]


# --------------------------------------------------------------------------
# Tiled path: batch grid, pinned weights, per-tile partial BN stats
# --------------------------------------------------------------------------
def _stage1_kernel(x_ref, w1_ref, h_ref, st_ref):
    hh = jnp.dot(x_ref[...], w1_ref[...], preferred_element_type=jnp.float32)
    h_ref[...] = hh
    s, ss = _col_stats(hh)
    st_ref[...] = jnp.concatenate([s, ss], axis=0)[None]


def _stage2_kernel(h_ref, aff_ref, w2_ref, h2_ref, st_ref):
    a = jnp.maximum(h_ref[...] * aff_ref[0:1, :] + aff_ref[1:2, :], 0.0)
    hh = jnp.dot(a.astype(jnp.bfloat16), w2_ref[...],
                 preferred_element_type=jnp.float32)
    h2_ref[...] = hh
    s, ss = _col_stats(hh)
    st_ref[...] = jnp.concatenate([s, ss], axis=0)[None]


def _stage3_kernel(h_ref, aff_ref, w3_ref, out_ref, *, n_pad):
    a = jnp.maximum(h_ref[...] * aff_ref[0:1, :] + aff_ref[1:2, :], 0.0)
    out = jnp.dot(a.astype(jnp.bfloat16), w3_ref[...],
                  preferred_element_type=jnp.float32) + aff_ref[2:3, :n_pad]
    out_ref[...] = out.astype(out_ref.dtype)


def _tiled_forward(x, params, b_valid):
    in_features = x.shape[1]
    h1 = params["w1"].shape[1]
    h2 = params["w2"].shape[1]
    num_classes = params["w3"].shape[1]
    assert h1 % LANE == 0 and h2 % LANE == 0, "hidden sizes must be lane-aligned"

    k_pad = _round_up(in_features, LANE)
    n_pad = _round_up(num_classes, LANE)
    assert n_pad <= h2
    tb = TILE_ROWS
    b_pad = _round_up(b_valid, tb)
    nt = b_pad // tb
    pad = b_pad - b_valid

    x_p = jnp.pad(x, ((0, b_pad - b_valid), (0, k_pad - in_features))).astype(jnp.bfloat16)
    w1 = jnp.pad(params["w1"], ((0, k_pad - in_features), (0, 0))).astype(jnp.bfloat16)
    w2 = params["w2"].astype(jnp.bfloat16)
    w3 = jnp.pad(params["w3"], ((0, 0), (0, n_pad - num_classes))).astype(jnp.bfloat16)

    cparams = pltpu.CompilerParams(dimension_semantics=("parallel",),
                                   vmem_limit_bytes=VMEM_LIMIT)

    def reduce_stats(st):
        return (jnp.sum(st[:, 0, :], axis=0, keepdims=True),
                jnp.sum(st[:, 1, :], axis=0, keepdims=True))

    def affine_from(s, ss, gamma, beta):
        mu = s / b_valid
        var = ss / b_valid - mu * mu
        scale = lax.rsqrt(var + EPS) * gamma
        shift = beta - mu * scale
        return scale, shift

    # ---- stage 1: x @ w1 per batch tile; per-tile partial stats ----
    h1_buf, st1 = pl.pallas_call(
        _stage1_kernel,
        grid=(nt,),
        in_specs=[pl.BlockSpec((tb, k_pad), lambda t: (t, 0)),
                  pl.BlockSpec((k_pad, h1), lambda t: (0, 0))],     # pinned weights
        out_specs=(pl.BlockSpec((tb, h1), lambda t: (t, 0)),
                   pl.BlockSpec((1, 2, h1), lambda t: (t, 0, 0))),
        out_shape=(jax.ShapeDtypeStruct((b_pad, h1), jnp.float32),
                   jax.ShapeDtypeStruct((nt, 2, h1), jnp.float32)),
        compiler_params=cparams,
    )(x_p, w1)

    s1, ss1 = reduce_stats(st1)     # padded x rows are exactly zero -> no mask
    scale1, shift1 = affine_from(s1, ss1, params["g1"], params["be1"])
    aff1 = jnp.concatenate([scale1, shift1], axis=0)                # (2, h1)

    # ---- stage 2: BN1 + ReLU + @ w2 per tile; per-tile partial stats ----
    h2_buf, st2 = pl.pallas_call(
        _stage2_kernel,
        grid=(nt,),
        in_specs=[pl.BlockSpec((tb, h1), lambda t: (t, 0)),
                  pl.BlockSpec((2, h1), lambda t: (0, 0)),
                  pl.BlockSpec((h1, h2), lambda t: (0, 0))],
        out_specs=(pl.BlockSpec((tb, h2), lambda t: (t, 0)),
                   pl.BlockSpec((1, 2, h2), lambda t: (t, 0, 0))),
        out_shape=(jax.ShapeDtypeStruct((b_pad, h2), jnp.float32),
                   jax.ShapeDtypeStruct((nt, 2, h2), jnp.float32)),
        compiler_params=cparams,
    )(h1_buf, aff1, w2)

    s2, ss2 = reduce_stats(st2)
    if pad:
        # Padded batch rows of h2 are all one identical constant row; remove
        # their contribution from the sums using the actual last padded row.
        d = h2_buf[b_pad - 1:b_pad, :]
        s2 = s2 - pad * d
        ss2 = ss2 - pad * (d * d)
    scale2, shift2 = affine_from(s2, ss2, params["g2"], params["be2"])
    aff2 = jnp.concatenate(
        [scale2, shift2,
         jnp.pad(params["b3"], ((0, 0), (0, h2 - num_classes)))], axis=0)  # (3, h2)

    # ---- stage 3: BN2 + ReLU + output head per tile ----
    out_p = pl.pallas_call(
        functools.partial(_stage3_kernel, n_pad=n_pad),
        grid=(nt,),
        in_specs=[pl.BlockSpec((tb, h2), lambda t: (t, 0)),
                  pl.BlockSpec((3, h2), lambda t: (0, 0)),
                  pl.BlockSpec((h2, n_pad), lambda t: (0, 0))],
        out_specs=pl.BlockSpec((tb, n_pad), lambda t: (t, 0)),
        out_shape=jax.ShapeDtypeStruct((b_pad, n_pad), jnp.float32),
        compiler_params=cparams,
    )(h2_buf, aff2, w3)
    return out_p[:b_valid, :num_classes]


# --------------------------------------------------------------------------
def mlp_forward(x, params, *, force_tiled=False):
    """x: (B, input_size) f32.  Returns (B, num_classes) f32."""
    B = x.shape[0]
    if not force_tiled and _round_up(B, BF16_SUBLANE) <= FUSED_MAX_ROWS:
        return _fused_forward(x, params, B)
    return _tiled_forward(x, params, B)


def init_params(key, input_size=50, hidden_sizes=(512, 512), num_classes=10):
    """Deterministic synthetic init (PyTorch-style uniform fan-in bounds), f32, unpadded."""
    sizes = [input_size, *hidden_sizes, num_classes]
    params = {}
    keys = jax.random.split(key, 2 * (len(sizes) - 1))
    for i in range(len(sizes) - 1):
        fan_in, fan_out = sizes[i], sizes[i + 1]
        bound = 1.0 / (fan_in ** 0.5)
        w = jax.random.uniform(keys[2 * i], (fan_in, fan_out),
                               minval=-bound, maxval=bound, dtype=jnp.float32)
        b = jax.random.uniform(keys[2 * i + 1], (1, fan_out),
                               minval=-bound, maxval=bound, dtype=jnp.float32)
        params[f"w{i + 1}"] = w
        params[f"b{i + 1}"] = b
        if i < len(hidden_sizes):  # BN affine (PyTorch default: gamma=1, beta=0)
            params[f"g{i + 1}"] = jnp.ones((1, fan_out), jnp.float32)
            params[f"be{i + 1}"] = jnp.zeros((1, fan_out), jnp.float32)
    return params


def _reference_forward(x, p, matmul_dtype=jnp.float32):
    """Pure-JAX reference (includes the linear biases; BN makes them a no-op)."""
    def mm(a, w):
        return jnp.dot(a.astype(matmul_dtype), w.astype(matmul_dtype),
                       preferred_element_type=jnp.float32)

    h = mm(x, p["w1"]) + p["b1"]
    mu, var = h.mean(0, keepdims=True), h.var(0, keepdims=True)
    h = jnp.maximum((h - mu) / jnp.sqrt(var + EPS) * p["g1"] + p["be1"], 0.0)
    h = mm(h, p["w2"]) + p["b2"]
    mu, var = h.mean(0, keepdims=True), h.var(0, keepdims=True)
    h = jnp.maximum((h - mu) / jnp.sqrt(var + EPS) * p["g2"] + p["be2"], 0.0)
    return mm(h, p["w3"]) + p["b3"]


if __name__ == "__main__":
    key = jax.random.PRNGKey(0)
    k_params, k_x, k_x2 = jax.random.split(key, 3)

    input_size, hidden_sizes, num_classes = 50, (512, 512), 10
    params = init_params(k_params, input_size, hidden_sizes, num_classes)

    # --- small batch -> single fused, VMEM-resident kernel ---
    batch = 8
    x = jax.random.normal(k_x, (batch, input_size), dtype=jnp.float32)
    out = mlp_forward(x, params)
    jax.block_until_ready(out)
    assert out.shape == (batch, num_classes)
    ref_bf16 = _reference_forward(x, params, matmul_dtype=jnp.bfloat16)
    assert jnp.allclose(out, ref_bf16, atol=5e-3, rtol=5e-3), "fused: mismatch vs bf16 reference"
    ref_f32 = _reference_forward(x, params, matmul_dtype=jnp.float32)
    assert jnp.allclose(out, ref_f32, atol=5e-2, rtol=5e-2), "fused: mismatch vs f32 reference"

    # --- larger batch -> tiled path: batch grid, pinned weights, partial BN stats ---
    batch2 = 1000
    x2 = jax.random.normal(k_x2, (batch2, input_size), dtype=jnp.float32)
    out2 = mlp_forward(x2, params, force_tiled=True)
    jax.block_until_ready(out2)
    assert out2.shape == (batch2, num_classes)
    ref2 = _reference_forward(x2, params, matmul_dtype=jnp.bfloat16)
    assert jnp.allclose(out2, ref2, atol=1e-2, rtol=1e-2), "tiled: mismatch vs bf16 reference"

    print("KERNEL_OK")
</pallas_src>

<mosaic_0001>
module attributes {stable_mosaic.version = 11 : i64} {
  func.func @_fused_mlp_kernel(%arg0: memref<16x128xbf16, #tpu.memory_space<vmem>>, %arg1: memref<128x512xbf16, #tpu.memory_space<vmem>>, %arg2: memref<512x512xbf16, #tpu.memory_space<vmem>>, %arg3: memref<512x128xbf16, #tpu.memory_space<vmem>>, %arg4: memref<5x512xf32, #tpu.memory_space<vmem>>, %arg5: memref<16x128xf32, #tpu.memory_space<vmem>>) attributes {dimension_semantics = [], scalar_prefetch = 0 : i64, scratch_operands = 0 : i64, tpu.core_type = #tpu.core_type<tc>} {
    %c0 = arith.constant 0 : index
    %c0_0 = arith.constant 0 : index
    %0 = vector.load %arg4[%c0, %c0_0] : memref<5x512xf32, #tpu.memory_space<vmem>>, vector<1x512xf32>
    %c1 = arith.constant 1 : index
    %c0_1 = arith.constant 0 : index
    %1 = vector.load %arg4[%c1, %c0_1] : memref<5x512xf32, #tpu.memory_space<vmem>>, vector<1x512xf32>
    %c2 = arith.constant 2 : index
    %c0_2 = arith.constant 0 : index
    %2 = vector.load %arg4[%c2, %c0_2] : memref<5x512xf32, #tpu.memory_space<vmem>>, vector<1x512xf32>
    %c3 = arith.constant 3 : index
    %c0_3 = arith.constant 0 : index
    %3 = vector.load %arg4[%c3, %c0_3] : memref<5x512xf32, #tpu.memory_space<vmem>>, vector<1x512xf32>
    %c4 = arith.constant 4 : index
    %c0_4 = arith.constant 0 : index
    %4 = vector.load %arg4[%c4, %c0_4] : memref<5x512xf32, #tpu.memory_space<vmem>>, vector<1x128xf32>
    %c0_5 = arith.constant 0 : index
    %c0_6 = arith.constant 0 : index
    %5 = vector.load %arg0[%c0_5, %c0_6] : memref<16x128xbf16, #tpu.memory_space<vmem>>, vector<16x128xbf16>
    %c0_7 = arith.constant 0 : index
    %c0_8 = arith.constant 0 : index
    %6 = vector.load %arg1[%c0_7, %c0_8] : memref<128x512xbf16, #tpu.memory_space<vmem>>, vector<128x512xbf16>
    %cst = arith.constant dense<0.000000e+00> : vector<16x512xf32>
    %7 = tpu.matmul %5, %6, %cst {dimension_numbers = #tpu.dot_dimension_numbers<[1], [0], [0], [1], [0, 0, 1, 1], [], []>} : vector<16x128xbf16>, vector<128x512xbf16>, vector<16x512xf32> -> vector<16x512xf32>
    %cst_9 = arith.constant dense<0.000000e+00> : vector<512xf32>
    %8 = vector.multi_reduction <add>, %7, %cst_9 [0] : vector<16x512xf32> to vector<512xf32>
    %9 = vector.shape_cast %8 : vector<512xf32> to vector<1x512xf32>
    %10 = arith.mulf %7, %7 : vector<16x512xf32>
    %cst_10 = arith.constant dense<0.000000e+00> : vector<512xf32>
    %11 = vector.multi_reduction <add>, %10, %cst_10 [0] : vector<16x512xf32> to vector<512xf32>
    %12 = vector.shape_cast %11 : vector<512xf32> to vector<1x512xf32>
    %cst_11 = arith.constant 1.250000e-01 : f32
    %13 = vector.broadcast %cst_11 : f32 to vector<1x512xf32>
    %14 = arith.mulf %9, %13 : vector<1x512xf32>
    %cst_12 = arith.constant 1.250000e-01 : f32
    %15 = vector.broadcast %cst_12 : f32 to vector<1x512xf32>
    %16 = arith.mulf %12, %15 : vector<1x512xf32>
    %17 = arith.mulf %14, %14 : vector<1x512xf32>
    %18 = arith.subf %16, %17 : vector<1x512xf32>
    %cst_13 = arith.constant 9.99999974E-6 : f32
    %19 = vector.broadcast %cst_13 : f32 to vector<1x512xf32>
    %20 = arith.addf %18, %19 : vector<1x512xf32>
    %21 = math.rsqrt %20 : vector<1x512xf32>
    %22 = arith.mulf %21, %0 : vector<1x512xf32>
    %23 = arith.mulf %14, %22 : vector<1x512xf32>
    %24 = arith.subf %1, %23 : vector<1x512xf32>
    %25 = vector.broadcast %22 : vector<1x512xf32> to vector<16x512xf32>
    %26 = arith.mulf %7, %25 : vector<16x512xf32>
    %27 = vector.broadcast %24 : vector<1x512xf32> to vector<16x512xf32>
    %28 = arith.addf %26, %27 : vector<16x512xf32>
    %cst_14 = arith.constant 0.000000e+00 : f32
    %29 = vector.broadcast %cst_14 : f32 to vector<16x512xf32>
    %30 = arith.maximumf %28, %29 : vector<16x512xf32>
    %31 = arith.truncf %30 : vector<16x512xf32> to vector<16x512xbf16>
    %c0_15 = arith.constant 0 : index
    %c0_16 = arith.constant 0 : index
    %32 = vector.load %arg2[%c0_15, %c0_16] : memref<512x512xbf16, #tpu.memory_space<vmem>>, vector<512x512xbf16>
    %cst_17 = arith.constant dense<0.000000e+00> : vector<16x512xf32>
    %33 = tpu.matmul %31, %32, %cst_17 {dimension_numbers = #tpu.dot_dimension_numbers<[1], [0], [0], [1], [0, 0, 1, 1], [], []>} : vector<16x512xbf16>, vector<512x512xbf16>, vector<16x512xf32> -> vector<16x512xf32>
    %cst_18 = arith.constant dense<0.000000e+00> : vector<512xf32>
    %34 = vector.multi_reduction <add>, %33, %cst_18 [0] : vector<16x512xf32> to vector<512xf32>
    %35 = vector.shape_cast %34 : vector<512xf32> to vector<1x512xf32>
    %36 = arith.mulf %33, %33 : vector<16x512xf32>
    %cst_19 = arith.constant dense<0.000000e+00> : vector<512xf32>
    %37 = vector.multi_reduction <add>, %36, %cst_19 [0] : vector<16x512xf32> to vector<512xf32>
    %38 = vector.shape_cast %37 : vector<512xf32> to vector<1x512xf32>
    %39 = vector.extract_strided_slice %33 {offsets = [15, 0], sizes = [1, 512], strides = [1, 1]} : vector<16x512xf32> to vector<1x512xf32>
    %cst_20 = arith.constant 8.000000e+00 : f32
    %40 = vector.broadcast %cst_20 : f32 to vector<1x512xf32>
    %41 = arith.mulf %40, %39 : vector<1x512xf32>
    %42 = arith.subf %35, %41 : vector<1x512xf32>
    %43 = arith.mulf %39, %39 : vector<1x512xf32>
    %cst_21 = arith.constant 8.000000e+00 : f32
    %44 = vector.broadcast %cst_21 : f32 to vector<1x512xf32>
    %45 = arith.mulf %44, %43 : vector<1x512xf32>
    %46 = arith.subf %38, %45 : vector<1x512xf32>
    %cst_22 = arith.constant 1.250000e-01 : f32
    %47 = vector.broadcast %cst_22 : f32 to vector<1x512xf32>
    %48 = arith.mulf %42, %47 : vector<1x512xf32>
    %cst_23 = arith.constant 1.250000e-01 : f32
    %49 = vector.broadcast %cst_23 : f32 to vector<1x512xf32>
    %50 = arith.mulf %46, %49 : vector<1x512xf32>
    %51 = arith.mulf %48, %48 : vector<1x512xf32>
    %52 = arith.subf %50, %51 : vector<1x512xf32>
    %cst_24 = arith.constant 9.99999974E-6 : f32
    %53 = vector.broadcast %cst_24 : f32 to vector<1x512xf32>
    %54 = arith.addf %52, %53 : vector<1x512xf32>
    %55 = math.rsqrt %54 : vector<1x512xf32>
    %56 = arith.mulf %55, %2 : vector<1x512xf32>
    %57 = arith.mulf %48, %56 : vector<1x512xf32>
    %58 = arith.subf %3, %57 : vector<1x512xf32>
    %59 = vector.broadcast %56 : vector<1x512xf32> to vector<16x512xf32>
    %60 = arith.mulf %33, %59 : vector<16x512xf32>
    %61 = vector.broadcast %58 : vector<1x512xf32> to vector<16x512xf32>
    %62 = arith.addf %60, %61 : vector<16x512xf32>
    %cst_25 = arith.constant 0.000000e+00 : f32
    %63 = vector.broadcast %cst_25 : f32 to vector<16x512xf32>
    %64 = arith.maximumf %62, %63 : vector<16x512xf32>
    %65 = arith.truncf %64 : vector<16x512xf32> to vector<16x512xbf16>
    %c0_26 = arith.constant 0 : index
    %c0_27 = arith.constant 0 : index
    %66 = vector.load %arg3[%c0_26, %c0_27] : memref<512x128xbf16, #tpu.memory_space<vmem>>, vector<512x128xbf16>
    %cst_28 = arith.constant dense<0.000000e+00> : vector<16x128xf32>
    %67 = tpu.matmul %65, %66, %cst_28 {dimension_numbers = #tpu.dot_dimension_numbers<[1], [0], [0], [1], [0, 0, 1, 1], [], []>} : vector<16x512xbf16>, vector<512x128xbf16>, vector<16x128xf32> -> vector<16x128xf32>
    %68 = vector.broadcast %4 : vector<1x128xf32> to vector<16x128xf32>
    %69 = arith.addf %67, %68 : vector<16x128xf32>
    %c0_29 = arith.constant 0 : index
    %c0_30 = arith.constant 0 : index
    %70 = vector.load %arg5[%c0_29, %c0_30] : memref<16x128xf32, #tpu.memory_space<vmem>>, vector<16x128xf32>
    tpu.vector_store %arg5[%c0_29, %c0_30], %69 {strides = array<i32>} : memref<16x128xf32, #tpu.memory_space<vmem>>, vector<16x128xf32>,
    return
  }
}

</mosaic_0001>

<bundles_post_ra>
// kernel: tpu_custom_call.1
= control target key start
LH: loop header
LB: loop body
LE: loop exit
PB: predicated region body
PF: predicated region fallthrough
CT: control target
= control target key end

     0   :  { %10 = vsyncpa [#allocation3], 0  ;;  %s3563_s0 = inlined_call_operand.hbm [shape: bf16[16,128], index: 0, kind: input, shape index: {}]   ;;  %s3564_s1 = inlined_call_operand.hbm [shape: bf16[128,512], index: 1, kind: input, shape index: {}]   ;;  %s3565_s2 = inlined_call_operand.hbm [shape: bf16[512,512], index: 2, kind: input, shape index: {}]   ;;  %s3566_s3 = inlined_call_operand.hbm [shape: bf16[512,128], index: 3, kind: input, shape index: {}]   ;;  %s3567_s4 = inlined_call_operand.hbm [shape: f32[5,512], index: 4, kind: input, shape index: {}]   ;;  %s3568_s5 = inlined_call_operand.hbm [shape: f32[16,128], index: 5, kind: output, shape index: {}]  }
   0x1   :  { %11 = vsyncpa [#allocation6], 0 }
   0x2   :  { %12 = vsyncpa [#allocation9], 0  ;;  %s31_s20 = sshll.u32 %s3564_s1, 4  ;;  %s32_s20 = int_to_ptr.hbm [resolvable:$true] %s31_s20 }
   0x3   :  { %13 = vsyncpa [#allocation4], 0  ;;  %s3240_s21 = smov [#allocation5]   ;;  %s3241_s23 = smov 256  }
   0x4   :  { %s33_s22 = sshll.u32 %s3240_s21, 4  ;;  %s3242_s24 = smov 16   ;;  %s34_s22 = int_to_ptr.vmem [resolvable:$true] %s33_s22 }
   0x5   :  { %39 = dma.hbm_to_vmem [thread:$0]  %s32_s20, 4096, %s34_s22, [#allocation6], %s3241_s23, %s3241_s23, %s3242_s24  }
   0x6   :  { %s57_s27 = sshll.u32 %s3566_s3, 4  ;;  %s3243_s28 = smov [#allocation8]   ;;  %s58_s27 = int_to_ptr.hbm [resolvable:$true] %s57_s27 }
   0x7   :  { %s59_s29 = sshll.u32 %s3243_s28, 4  ;;  %s18_s7 = sshll.u32 %s3563_s0, 4  ;;  %s60_s29 = int_to_ptr.vmem [resolvable:$true] %s59_s29  ;;  %s19_s7 = int_to_ptr.hbm [resolvable:$true] %s18_s7 }
   0x8   :  { %s3244_s1 = smov 64   ;;  %s3245_s8 = smov 4  }
   0x9   :  { %65 = dma.hbm_to_vmem [thread:$0]  %s58_s27, 4096, %s60_s29, [#allocation9], %s3244_s1, %s3244_s1, %s3245_s8  }
   0xa   :  { %s44_s11 = sshll.u32 %s3565_s2, 4  ;;  %s3246_s12 = smov [#allocation2]   ;;  %s45_s11 = int_to_ptr.hbm [resolvable:$true] %s44_s11 }
   0xb   :  { %s20_s13 = sshll.u32 %s3246_s12, 4  ;;  %s3247_s3 = smov [#allocation7]   ;;  %s21_s13 = int_to_ptr.vmem [resolvable:$true] %s20_s13 }
   0xc   :  { %26 = dma.hbm_to_vmem [thread:$0]  %s19_s7, 128, %s21_s13, [#allocation3], %s3244_s1, %s3244_s1, %s3245_s8  }
   0xd   :  { %s46_s14 = sshll.u32 %s3247_s3, 4  ;;  %s71_s0 = sshll.u32 %s3567_s4, 4  ;;  %s47_s14 = int_to_ptr.vmem [resolvable:$true] %s46_s14  ;;  %s72_s0 = int_to_ptr.hbm [resolvable:$true] %s71_s0 }
   0xe   :  { %52 = dma.hbm_to_vmem [thread:$0]  %s45_s11, 16384, %s47_s14, [#allocation6], %s3241_s23, %s3241_s23, %s3242_s24  }
   0xf   :  { %s3248_s17 = smov [#allocation10]  }
  0x10   :  { %s73_s18 = sshll.u32 %s3248_s17, 4  ;;  %s74_s18 = int_to_ptr.vmem [resolvable:$true] %s73_s18 }
  0x11   :  { %76 = dma.hbm_to_vmem [thread:$0]  %s72_s0, 512, %s74_s18, [#allocation9]  }
  0x12   :  { %3232 = dma.done.wait [#allocation3], 128  }
  0x13   :  { %3233 = vsyncadd [#allocation3], 4294967168 }
  0x14   :  { %3234 = dma.done.wait [#allocation6], 20480  }
  0x15   :  { %3235 = vsyncadd [#allocation6], 4294946816 }
  0x16   :  { %3236 = dma.done.wait [#allocation9], 4608  }
  0x17   :  { %3237 = vsyncadd [#allocation9], 4294962688  ;;  %v2213_v0 = vld [vmem:[#allocation5 + $0xe0] sm:$0xf]  ;;  %v2898_v1 = vld [vmem:[#allocation5 + $0xec] sm:$0xf0] }
  0x18   :  { %v2896_v2 = vld [vmem:[#allocation5 + $0xe4] sm:$0xf]  ;;  %v2214_v3 = vor.u32 %v2898_v1, %v2213_v0  ;;  %v2215_v4 = vld [vmem:[#allocation5 + $0xf0] sm:$0xf0]  ;;  %v2221_v5 = vld [vmem:[#allocation5 + $0xe8] sm:$0xf] }
  0x19   :  { %v2899_v6 = vld [vmem:[#allocation5 + $0xf4] sm:$0xf0]  ;;  %v2218_v7 = vor.u32 %v2896_v2, %v2215_v4  ;;  %v2897_v9 = vld [vmem:[#allocation5 + $0xec] sm:$0xf]  ;;  %v2223_v10 = vld [vmem:[#allocation5 + $0xf8] sm:$0xf0] }
  0x1a   :  { %v2222_v8 = vor.u32 %v2899_v6, %v2221_v5  ;;  %v2197_v11 = vld [vmem:[#allocation5 + $0xc0] sm:$0xf]  ;;  %305 = vmatpush.bf16.msra.mxu0 %v2214_v3  ;;  %v2226_v12 = vor.u32 %v2897_v9, %v2223_v10  ;;  %v2894_v13 = vld [vmem:[#allocation5 + $0xcc] sm:$0xf0]  ;;  %v2892_v14 = vld [vmem:[#allocation5 + $0xc4] sm:$0xf] }
  0x1b   :  { %v2199_v15 = vld [vmem:[#allocation5 + $0xd0] sm:$0xf0]  ;;  %319 = vmatpush.bf16.msra.mxu1 %v2218_v7  ;;  %v2198_v16 = vor.u32 %v2894_v13, %v2197_v11  ;;  %v2205_v18 = vld [vmem:[#allocation5 + $0xc8] sm:$0xf]  ;;  %v2895_v19 = vld [vmem:[#allocation5 + $0xd4] sm:$0xf0] }
  0x1c   :  { %333 = vmatpush.bf16.msra.mxu2 %v2222_v8  ;;  %v2202_v17 = vor.u32 %v2892_v14, %v2199_v15  ;;  %v2893_v20 = vld [vmem:[#allocation5 + $0xcc] sm:$0xf]  ;;  %347 = vmatpush.bf16.msra.mxu3 %v2226_v12  ;;  %v2206_v21 = vor.u32 %v2895_v19, %v2205_v18  ;;  %v2207_v22 = vld [vmem:[#allocation5 + $0xd8] sm:$0xf0]  ;;  %v2181_v23 = vld [vmem:[#allocation5 + $0xa0] sm:$0xf] }
  0x1d   :  { %v2890_v24 = vld [vmem:[#allocation5 + $0xac] sm:$0xf0]  ;;  %v2210_v25 = vor.u32 %v2893_v20, %v2207_v22  ;;  %v2888_v26 = vld [vmem:[#allocation5 + $0xa4] sm:$0xf]  ;;  %v2183_v27 = vld [vmem:[#allocation5 + $0xb0] sm:$0xf0] }
  0x1e   :  { %v2189_v28 = vld [vmem:[#allocation5 + $0xa8] sm:$0xf]  ;;  %306 = vmatpush.bf16.msra.mxu0 %v2198_v16  ;;  %v2182_v29 = vor.u32 %v2890_v24, %v2181_v23  ;;  %v2891_v30 = vld [vmem:[#allocation5 + $0xb4] sm:$0xf0]  ;;  %v2889_v31 = vld [vmem:[#allocation5 + $0xac] sm:$0xf]  ;;  %v2186_v33 = vor.u32 %v2888_v26, %v2183_v27 }
  0x1f   :  { %v2191_v32 = vld [vmem:[#allocation5 + $0xb8] sm:$0xf0]  ;;  %320 = vmatpush.bf16.msra.mxu1 %v2202_v17  ;;  %v2190_v34 = vor.u32 %v2891_v30, %v2189_v28  ;;  %v2165_v35 = vld [vmem:[#allocation5 + $0x80] sm:$0xf]  ;;  %v2886_v36 = vld [vmem:[#allocation5 + $0x8c] sm:$0xf0] }
  0x20   :  { %334 = vmatpush.bf16.msra.mxu2 %v2206_v21  ;;  %v2884_v37 = vld [vmem:[#allocation5 + $0x84] sm:$0xf]  ;;  %348 = vmatpush.bf16.msra.mxu3 %v2210_v25  ;;  %v2194_v38 = vor.u32 %v2889_v31, %v2191_v32  ;;  %v2167_v39 = vld [vmem:[#allocation5 + $0x90] sm:$0xf0]  ;;  %v2173_v40 = vld [vmem:[#allocation5 + $0x88] sm:$0xf]  ;;  %v2166_v44 = vor.u32 %v2886_v36, %v2165_v35 }
  0x21   :  { %v2887_v41 = vld [vmem:[#allocation5 + $0x94] sm:$0xf0]  ;;  %v2885_v42 = vld [vmem:[#allocation5 + $0x8c] sm:$0xf]  ;;  %v2175_v43 = vld [vmem:[#allocation5 + $0x98] sm:$0xf0]  ;;  %v2170_v45 = vor.u32 %v2884_v37, %v2167_v39 }
  0x22   :  { %307 = vmatpush.bf16.msra.mxu0 %v2182_v29  ;;  %v2174_v46 = vor.u32 %v2887_v41, %v2173_v40  ;;  %v2149_v47 = vld [vmem:[#allocation5 + $0x60] sm:$0xf]  ;;  %v2882_v48 = vld [vmem:[#allocation5 + $0x6c] sm:$0xf0]  ;;  %v2880_v49 = vld [vmem:[#allocation5 + $0x64] sm:$0xf]  ;;  %v2178_v50 = vor.u32 %v2885_v42, %v2175_v43 }
  0x23   :  { %321 = vmatpush.bf16.msra.mxu1 %v2186_v33  ;;  %v2151_v51 = vld [vmem:[#allocation5 + $0x70] sm:$0xf0]  ;;  %v2157_v52 = vld [vmem:[#allocation5 + $0x68] sm:$0xf]  ;;  %v2883_v53 = vld [vmem:[#allocation5 + $0x74] sm:$0xf0]  ;;  %v2150_v56 = vor.u32 %v2882_v48, %v2149_v47 }
  0x24   :  { %335 = vmatpush.bf16.msra.mxu2 %v2190_v34  ;;  %349 = vmatpush.bf16.msra.mxu3 %v2194_v38  ;;  %v2881_v54 = vld [vmem:[#allocation5 + $0x6c] sm:$0xf]  ;;  %v2159_v55 = vld [vmem:[#allocation5 + $0x78] sm:$0xf0]  ;;  %v2154_v57 = vor.u32 %v2880_v49, %v2151_v51  ;;  %v2158_v58 = vor.u32 %v2883_v53, %v2157_v52  ;;  %v2133_v59 = vld [vmem:[#allocation5 + $0x40] sm:$0xf] }
  0x25   :  { %v2878_v60 = vld [vmem:[#allocation5 + $0x4c] sm:$0xf0]  ;;  %v2876_v61 = vld [vmem:[#allocation5 + $0x44] sm:$0xf]  ;;  %v2162_v62 = vor.u32 %v2881_v54, %v2159_v55  ;;  %v2135_v63 = vld [vmem:[#allocation5 + $0x50] sm:$0xf0] }
  0x26   :  { %308 = vmatpush.bf16.msra.mxu0 %v2166_v44  ;;  %v2141_v0 = vld [vmem:[#allocation5 + $0x48] sm:$0xf]  ;;  %v2879_v1 = vld [vmem:[#allocation5 + $0x54] sm:$0xf0]  ;;  %v2877_v2 = vld [vmem:[#allocation5 + $0x4c] sm:$0xf]  ;;  %v2134_v4 = vor.u32 %v2878_v60, %v2133_v59  ;;  %v2138_v5 = vor.u32 %v2876_v61, %v2135_v63 }
  0x27   :  { %322 = vmatpush.bf16.msra.mxu1 %v2170_v45  ;;  %v2143_v3 = vld [vmem:[#allocation5 + $0x58] sm:$0xf0]  ;;  %v2142_v6 = vor.u32 %v2879_v1, %v2141_v0  ;;  %v2117_v7 = vld [vmem:[#allocation5 + $0x20] sm:$0xf]  ;;  %v2874_v8 = vld [vmem:[#allocation5 + $0x2c] sm:$0xf0] }
  0x28   :  { %336 = vmatpush.bf16.msra.mxu2 %v2174_v46  ;;  %350 = vmatpush.bf16.msra.mxu3 %v2178_v50  ;;  %v2872_v9 = vld [vmem:[#allocation5 + $0x24] sm:$0xf]  ;;  %v2146_v10 = vor.u32 %v2877_v2, %v2143_v3  ;;  %v2119_v11 = vld [vmem:[#allocation5 + $0x30] sm:$0xf0]  ;;  %v2125_v12 = vld [vmem:[#allocation5 + $0x28] sm:$0xf]  ;;  %v2118_v16 = vor.u32 %v2874_v8, %v2117_v7 }
  0x29   :  { %v2875_v13 = vld [vmem:[#allocation5 + $0x34] sm:$0xf0]  ;;  %v2873_v14 = vld [vmem:[#allocation5 + $0x2c] sm:$0xf]  ;;  %v2127_v15 = vld [vmem:[#allocation5 + $0x38] sm:$0xf0]  ;;  %v2122_v17 = vor.u32 %v2872_v9, %v2119_v11 }
  0x2a   :  { %309 = vmatpush.bf16.msra.mxu0 %v2150_v56  ;;  %v2126_v18 = vor.u32 %v2875_v13, %v2125_v12  ;;  %v2101_v19 = vld [vmem:[#allocation5] sm:$0xf]  ;;  %v2870_v20 = vld [vmem:[#allocation5 + $0xc] sm:$0xf0]  ;;  %v2868_v21 = vld [vmem:[#allocation5 + $0x4] sm:$0xf]  ;;  %v2130_v22 = vor.u32 %v2873_v14, %v2127_v15 }
  0x2b   :  { %323 = vmatpush.bf16.msra.mxu1 %v2154_v57  ;;  %v2103_v23 = vld [vmem:[#allocation5 + $0x10] sm:$0xf0]  ;;  %v2109_v24 = vld [vmem:[#allocation5 + $0x8] sm:$0xf]  ;;  %v2871_v25 = vld [vmem:[#allocation5 + $0x14] sm:$0xf0]  ;;  %v2102_v28 = vor.u32 %v2870_v20, %v2101_v19 }
  0x2c   :  { %337 = vmatpush.bf16.msra.mxu2 %v2158_v58  ;;  %351 = vmatpush.bf16.msra.mxu3 %v2162_v62  ;;  %v2869_v26 = vld [vmem:[#allocation5 + $0xc] sm:$0xf]  ;;  %v2111_v27 = vld [vmem:[#allocation5 + $0x18] sm:$0xf0]  ;;  %v2106_v29 = vor.u32 %v2868_v21, %v2103_v23  ;;  %v2110_v30 = vor.u32 %v2871_v25, %v2109_v24  ;;  %v2341_v33 = vld [vmem:[#allocation7 + $0xe0] sm:$0xf] }
  0x2d   :  { %v2114_v31 = vor.u32 %v2869_v26, %v2111_v27  ;;  %v2867_v32 = vld [vmem:[#allocation2] sm:$0xff]  ;;  %v2930_v34 = vld [vmem:[#allocation7 + $0xec] sm:$0xf0]  ;;  %v2469_v35 = vld [vmem:[#allocation7 + $0x1e0] sm:$0xf]  ;;  %vm509_vm12 = vcmask 1040384  }
  0x2e   :  { %310 = vmatpush.bf16.msra.mxu0 %v2134_v4  ;;  %v2342_v36 = vor.u32 %v2930_v34, %v2341_v33  ;;  %v2962_v37 = vld [vmem:[#allocation7 + $0x1ec] sm:$0xf0]  ;;  %v2597_v38 = vld [vmem:[#allocation7 + $0x2e0] sm:$0xf]  ;;  %vm511_vm13 = vcmask 1042434   ;;  %vm513_vm14 = vcmask 1041408  }
  0x2f   :  { %324 = vmatpush.bf16.msra.mxu1 %v2138_v5  ;;  %v2994_v39 = vld [vmem:[#allocation7 + $0x2ec] sm:$0xf0]  ;;  %v2470_v40 = vor.u32 %v2962_v37, %v2469_v35  ;;  %v2725_v42 = vld [vmem:[#allocation7 + $0x3e0] sm:$0xf]  ;;  %s3249_s2 = smov [#allocation11]   ;;  %s2080_s21 = sshll.u32 %s3568_s5, 4  ;;  %s2081_s21 = int_to_ptr.hbm [resolvable:$true] %s2080_s21 }
  0x30   :  { %338 = vmatpush.bf16.msra.mxu2 %v2142_v6  ;;  %352 = vmatpush.bf16.msra.mxu3 %v2146_v10  ;;  %v2598_v41 = vor.u32 %v2994_v39, %v2597_v38  ;;  %v3026_v43 = vld [vmem:[#allocation7 + $0x3ec] sm:$0xf0]  ;;  %v2325_v45 = vld [vmem:[#allocation7 + $0xc0] sm:$0xf]  ;;  %s2078_s4 = sshll.u32 %s3249_s2, 4  ;;  %s3250_s22 = smov 128   ;;  %s2079_s4 = int_to_ptr.vmem [resolvable:$true] %s2078_s4 }
  0x31   :  { %v2726_v44 = vor.u32 %v3026_v43, %v2725_v42  ;;  %v2926_v46 = vld [vmem:[#allocation7 + $0xcc] sm:$0xf0]  ;;  %v2453_v47 = vld [vmem:[#allocation7 + $0x1c0] sm:$0xf]  ;;  %s3251_s23 = smov 8  }
  0x32   :  { %311 = vmatpush.bf16.msra.mxu0 %v2118_v16  ;;  %v2326_v48 = vor.u32 %v2926_v46, %v2325_v45  ;;  %v2958_v49 = vld [vmem:[#allocation7 + $0x1cc] sm:$0xf0]  ;;  %v2581_v50 = vld [vmem:[#allocation7 + $0x2c0] sm:$0xf] }
  0x33   :  { %325 = vmatpush.bf16.msra.mxu1 %v2122_v17  ;;  %v2990_v51 = vld [vmem:[#allocation7 + $0x2cc] sm:$0xf0]  ;;  %v2454_v52 = vor.u32 %v2958_v49, %v2453_v47  ;;  %v2709_v54 = vld [vmem:[#allocation7 + $0x3c0] sm:$0xf] }
  0x34   :  { %339 = vmatpush.bf16.msra.mxu2 %v2126_v18  ;;  %353 = vmatpush.bf16.msra.mxu3 %v2130_v22  ;;  %v2582_v53 = vor.u32 %v2990_v51, %v2581_v50  ;;  %v3022_v55 = vld [vmem:[#allocation7 + $0x3cc] sm:$0xf0]  ;;  %v2309_v57 = vld [vmem:[#allocation7 + $0xa0] sm:$0xf] }
  0x35   :  { %v2710_v56 = vor.u32 %v3022_v55, %v2709_v54  ;;  %v2922_v58 = vld [vmem:[#allocation7 + $0xac] sm:$0xf0]  ;;  %v2437_v59 = vld [vmem:[#allocation7 + $0x1a0] sm:$0xf] }
  0x36   :  { %312 = vmatpush.bf16.msra.mxu0 %v2102_v28  ;;  %v2310_v60 = vor.u32 %v2922_v58, %v2309_v57  ;;  %v2954_v61 = vld [vmem:[#allocation7 + $0x1ac] sm:$0xf0]  ;;  %v2565_v62 = vld [vmem:[#allocation7 + $0x2a0] sm:$0xf] }
  0x37   :  { %326 = vmatpush.bf16.msra.mxu1 %v2106_v29  ;;  %v2986_v63 = vld [vmem:[#allocation7 + $0x2ac] sm:$0xf0]  ;;  %v2438_v1 = vor.u32 %v2954_v61, %v2437_v59  ;;  %v2693_v3 = vld [vmem:[#allocation7 + $0x3a0] sm:$0xf] }
  0x38   :  { %340 = vmatpush.bf16.msra.mxu2 %v2110_v30  ;;  %354 = vmatpush.bf16.msra.mxu3 %v2114_v31  ;;  %v2566_v2 = vor.u32 %v2986_v63, %v2565_v62  ;;  %v3018_v4 = vld [vmem:[#allocation7 + $0x3ac] sm:$0xf0]  ;;  %v2293_v7 = vld [vmem:[#allocation7 + $0x80] sm:$0xf] }
  0x39   :  { %313 = vmatmul.bf16.vlgmr.msra.gmra.mxu0 %v2867_v32  ;;  %v2694_v6 = vor.u32 %v3018_v4, %v2693_v3  ;;  %v2918_v8 = vld [vmem:[#allocation7 + $0x8c] sm:$0xf0]  ;;  %v2421_v9 = vld [vmem:[#allocation7 + $0x180] sm:$0xf] }
  0x3a   :  { %327 = vmatmul.bf16.vlgmr.msra.gmra.mxu1 %v2867_v32  ;;  %1326 = vmatpush.bf16.msrb.mxu0 %v2342_v36  ;;  %v2294_v10 = vor.u32 %v2918_v8, %v2293_v7  ;;  %v2950_v11 = vld [vmem:[#allocation7 + $0x18c] sm:$0xf0]  ;;  %v2549_v12 = vld [vmem:[#allocation7 + $0x280] sm:$0xf] }
  0x3b   :  { %341 = vmatmul.bf16.vlgmr.msra.gmra.mxu2 %v2867_v32  ;;  %355 = vmatmul.bf16.vlgmr.msra.gmra.mxu3 %v2867_v32  ;;  %v2982_v13 = vld [vmem:[#allocation7 + $0x28c] sm:$0xf0]  ;;  %v2422_v14 = vor.u32 %v2950_v11, %v2421_v9  ;;  %v2677_v16 = vld [vmem:[#allocation7 + $0x380] sm:$0xf] }
  0x3c   :  { %1340 = vmatpush.bf16.msrb.mxu1 %v2470_v40  ;;  %1354 = vmatpush.bf16.msrb.mxu2 %v2598_v41  ;;  %v2550_v15 = vor.u32 %v2982_v13, %v2549_v12  ;;  %v3014_v17 = vld [vmem:[#allocation7 + $0x38c] sm:$0xf0]  ;;  %v2277_v19 = vld [vmem:[#allocation7 + $0x60] sm:$0xf] }
  0x3d   :  { %1368 = vmatpush.bf16.msrb.mxu3 %v2726_v44  ;;  %v2678_v18 = vor.u32 %v3014_v17, %v2677_v16  ;;  %v2914_v20 = vld [vmem:[#allocation7 + $0x6c] sm:$0xf0]  ;;  %v2405_v21 = vld [vmem:[#allocation7 + $0x160] sm:$0xf] }
  0x3e   :  { %1327 = vmatpush.bf16.msrb.mxu0 %v2326_v48  ;;  %v2278_v24 = vor.u32 %v2914_v20, %v2277_v19  ;;  %v2946_v25 = vld [vmem:[#allocation7 + $0x16c] sm:$0xf0]  ;;  %v2533_v26 = vld [vmem:[#allocation7 + $0x260] sm:$0xf] }
  0x3f   :  { %v2978_v27 = vld [vmem:[#allocation7 + $0x26c] sm:$0xf0]  ;;  %v2406_v30 = vor.u32 %v2946_v25, %v2405_v21  ;;  %v2661_v32 = vld [vmem:[#allocation7 + $0x360] sm:$0xf] }
  0x40   :  { %1341 = vmatpush.bf16.msrb.mxu1 %v2454_v52  ;;  %1355 = vmatpush.bf16.msrb.mxu2 %v2582_v53  ;;  %v2534_v31 = vor.u32 %v2978_v27, %v2533_v26  ;;  %v3010_v33 = vld [vmem:[#allocation7 + $0x36c] sm:$0xf0]  ;;  %v2261_v41 = vld [vmem:[#allocation7 + $0x40] sm:$0xf] }
  0x41   :  { %1369 = vmatpush.bf16.msrb.mxu3 %v2710_v56  ;;  %v2662_v37 = vor.u32 %v3010_v33, %v2661_v32  ;;  %v2910_v42 = vld [vmem:[#allocation7 + $0x4c] sm:$0xf0]  ;;  %v2389_v43 = vld [vmem:[#allocation7 + $0x140] sm:$0xf] }
  0x42   :  { %1328 = vmatpush.bf16.msrb.mxu0 %v2310_v60  ;;  %v2262_v46 = vor.u32 %v2910_v42, %v2261_v41  ;;  %v2942_v47 = vld [vmem:[#allocation7 + $0x14c] sm:$0xf0]  ;;  %v2517_v48 = vld [vmem:[#allocation7 + $0x240] sm:$0xf] }
  0x43   :  { %v2390_v51 = vor.u32 %v2942_v47, %v2389_v43  ;;  %v2974_v52 = vld [vmem:[#allocation7 + $0x24c] sm:$0xf0]  ;;  %v2645_v53 = vld [vmem:[#allocation7 + $0x340] sm:$0xf] }
  0x44   :  { %1342 = vmatpush.bf16.msrb.mxu1 %v2438_v1  ;;  %1356 = vmatpush.bf16.msrb.mxu2 %v2566_v2  ;;  %v2518_v56 = vor.u32 %v2974_v52, %v2517_v48  ;;  %v3006_v57 = vld [vmem:[#allocation7 + $0x34c] sm:$0xf0]  ;;  %v2245_v61 = vld [vmem:[#allocation7 + $0x20] sm:$0xf] }
  0x45   :  { %1370 = vmatpush.bf16.msrb.mxu3 %v2694_v6  ;;  %v2646_v60 = vor.u32 %v3006_v57, %v2645_v53  ;;  %v2906_v62 = vld [vmem:[#allocation7 + $0x2c] sm:$0xf0]  ;;  %v2501_v42 = vld [vmem:[#allocation7 + $0x220] sm:$0xf] }
  0x46   :  { %1329 = vmatpush.bf16.msrb.mxu0 %v2294_v10  ;;  %v2246_v3 = vor.u32 %v2906_v62, %v2245_v61  ;;  %v2970_v43 = vld [vmem:[#allocation7 + $0x22c] sm:$0xf0]  ;;  %v2629_v48 = vld [vmem:[#allocation7 + $0x320] sm:$0xf] }
  0x48   :  { %1343 = vmatpush.bf16.msrb.mxu1 %v2422_v14  ;;  %1357 = vmatpush.bf16.msrb.mxu2 %v2550_v15 }
  0x49   :  { %1371 = vmatpush.bf16.msrb.mxu3 %v2678_v18 }
  0x4a   :  { %1330 = vmatpush.bf16.msrb.mxu0 %v2278_v24 }
  0x4c   :  { %1344 = vmatpush.bf16.msrb.mxu1 %v2406_v30  ;;  %1358 = vmatpush.bf16.msrb.mxu2 %v2534_v31 }
  0x4d   :  { %1372 = vmatpush.bf16.msrb.mxu3 %v2662_v37  ;;  %v2373_v37 = vld [vmem:[#allocation7 + $0x120] sm:$0xf] }
  0x4e   :  { %1331 = vmatpush.bf16.msrb.mxu0 %v2262_v46 }
  0x50   :  { %1345 = vmatpush.bf16.msrb.mxu1 %v2390_v51  ;;  %1359 = vmatpush.bf16.msrb.mxu2 %v2518_v56 }
  0x51   :  { %1373 = vmatpush.bf16.msrb.mxu3 %v2646_v60 }
  0x52   :  { %1332 = vmatpush.bf16.msrb.mxu0 %v2246_v3 }
  0xb6   :  { %v3297_v0 = vpop.f32.mrf.mxu0 }
  0xb7   :  { %v3299_v5 = vpop.f32.mrf.mxu1  ;;  %v389_v22 = vmul.f32 %v3297_v0, %v3297_v0 }
  0xb8   :  { %v390_v38 = vmul.f32 %v3299_v5, %v3299_v5 }
  0xbe   :  { %v3303_v23 = vpop.f32.mrf.mxu2  ;;  %v3305_v28 = vpop.f32.mrf.mxu3 }
  0xbf   :  { %v3307_v29 = vpop.f32.mrf.mxu0  ;;  %v3313_v36 = vpop.f32.mrf.mxu1  ;;  %v391_v4 = vmul.f32 %v3303_v23, %v3303_v23  ;;  %v392_v10 = vmul.f32 %v3305_v28, %v3305_v28 }
  0xc0   :  { %v361_v34 = vadd.f32 %v3307_v29, %v3297_v0  ;;  %v393_v35 = vmul.f32 %v3307_v29, %v3307_v29  ;;  %v368_v39 = vadd.f32 %v3313_v36, %v3299_v5  ;;  %v394_v40 = vmul.f32 %v3313_v36, %v3313_v36 }
  0xc2   :  { %v362_v44 = vrot.slane %v361_v34, 4  ;;  %v397_v45 = vadd.f32 %v393_v35, %v389_v22  ;;  %v369_v49 = vrot.slane %v368_v39, 4  ;;  %v404_v50 = vadd.f32 %v394_v40, %v390_v38  ;;  %v2938_v38 = vld [vmem:[#allocation7 + $0x12c] sm:$0xf0] }
  0xc4   :  { %v363_v54 = vadd.f32 %v362_v44, %v361_v34  ;;  %v398_v55 = vrot.slane %v397_v45, 4  ;;  %v370_v58 = vadd.f32 %v369_v49, %v368_v39  ;;  %v405_v59 = vrot.slane %v404_v50, 4  ;;  %v3002_v49 = vld [vmem:[#allocation7 + $0x32c] sm:$0xf0] }
  0xc6   :  { %v364_v63 = vrot.slane %v363_v54, 2  ;;  %v399_v1 = vadd.f32 %v398_v55, %v397_v45  ;;  %v3321_v2 = vpop.f32.mrf.mxu2  ;;  %v371_v6 = vrot.slane %v370_v58, 2  ;;  %v406_v7 = vadd.f32 %v405_v59, %v404_v50  ;;  %v3327_v9 = vpop.f32.mrf.mxu3  ;;  %v2902_v59 = vld [vmem:[#allocation7 + $0xc] sm:$0xf0] }
  0xc7   :  { %v375_v8 = vadd.f32 %v3321_v2, %v3303_v23  ;;  %v395_v13 = vmul.f32 %v3321_v2, %v3321_v2  ;;  %v382_v17 = vadd.f32 %v3327_v9, %v3305_v28  ;;  %v396_v21 = vmul.f32 %v3327_v9, %v3327_v9 }
  0xc8   :  { %v365_v11 = vadd.f32 %v364_v63, %v363_v54  ;;  %v400_v12 = vrot.slane %v399_v1, 2  ;;  %v372_v14 = vadd.f32 %v371_v6, %v370_v58  ;;  %v407_v15 = vrot.slane %v406_v7, 2  ;;  %v2229_v54 = vld [vmem:[#allocation7] sm:$0xf] }
  0xc9   :  { %v376_v16 = vrot.slane %v375_v8, 4  ;;  %v411_v20 = vadd.f32 %v395_v13, %v391_v4  ;;  %v383_v26 = vrot.slane %v382_v17, 4  ;;  %v418_v32 = vadd.f32 %v396_v21, %v392_v10  ;;  %v2485_v10 = vld [vmem:[#allocation7 + $0x200] sm:$0xf]  ;;  %v2471_v21 = vld [vmem:[#allocation7 + $0x1f0] sm:$0xf0] }
  0xca   :  { %v366_v18 = vrot.slane %v365_v11, 1  ;;  %v401_v19 = vadd.f32 %v400_v12, %v399_v1  ;;  %v373_v22 = vrot.slane %v372_v14, 1  ;;  %v408_v24 = vadd.f32 %v407_v15, %v406_v7  ;;  %v2357_v7 = vld [vmem:[#allocation7 + $0x100] sm:$0xf] }
  0xcb   :  { %v377_v25 = vadd.f32 %v376_v16, %v375_v8  ;;  %v412_v31 = vrot.slane %v411_v20, 4  ;;  %v384_v47 = vadd.f32 %v383_v26, %v382_v17  ;;  %v419_v53 = vrot.slane %v418_v32, 4  ;;  %v2934_v8 = vld [vmem:[#allocation7 + $0x10c] sm:$0xf0]  ;;  %v2613_v16 = vld [vmem:[#allocation7 + $0x300] sm:$0xf] }
  0xcc   :  { %v367_v27 = vadd.f32 %v366_v18, %v365_v11  ;;  %v402_v30 = vrot.slane %v401_v19, 1  ;;  %v374_v33 = vadd.f32 %v373_v22, %v372_v14  ;;  %v409_v34 = vrot.slane %v408_v24, 1  ;;  %v2966_v11 = vld [vmem:[#allocation7 + $0x20c] sm:$0xf0]  ;;  %v2928_v18 = vld [vmem:[#allocation7 + $0xe4] sm:$0xf] }
  0xcd   :  { %v378_v35 = vrot.slane %v377_v25, 2  ;;  %v413_v41 = vadd.f32 %v412_v31, %v411_v20  ;;  %v385_v58 = vrot.slane %v384_v47, 2  ;;  %v420_v62 = vadd.f32 %v419_v53, %v418_v32  ;;  %v2998_v17 = vld [vmem:[#allocation7 + $0x30c] sm:$0xf0]  ;;  %v2960_v20 = vld [vmem:[#allocation7 + $0x1e4] sm:$0xf] }
  0xce   :  { %v403_v39 = vadd.f32 %v402_v30, %v401_v19  ;;  %v3337_v40 = vmul.f32 0.125, %v367_v27  ;;  %v410_v44 = vadd.f32 %v409_v34, %v408_v24  ;;  %v3339_v45 = vmul.f32 0.125, %v374_v33  ;;  %v2343_v19 = vld [vmem:[#allocation7 + $0xf0] sm:$0xf0]  ;;  %v2992_v30 = vld [vmem:[#allocation7 + $0x2e4] sm:$0xf] }
  0xcf   :  { %v379_v46 = vadd.f32 %v378_v35, %v377_v25  ;;  %v414_v52 = vrot.slane %v413_v41, 2  ;;  %v2374_v63 = vor.u32 %v2938_v38, %v2373_v37  ;;  %v386_v4 = vadd.f32 %v385_v58, %v384_v47  ;;  %v2599_v31 = vld [vmem:[#allocation7 + $0x2f0] sm:$0xf0]  ;;  %v3024_v32 = vld [vmem:[#allocation7 + $0x3e4] sm:$0xf] }
  0xd0   :  { %v429_v50 = vmul.f32 0.125, %v403_v39  ;;  %v433_v51 = vmul.f32 %v3337_v40, %v3337_v40  ;;  %v430_v55 = vmul.f32 0.125, %v410_v44  ;;  %v434_v56 = vmul.f32 %v3339_v45, %v3339_v45  ;;  %v2727_v35 = vld [vmem:[#allocation7 + $0x3f0] sm:$0xf0]  ;;  %v2924_v37 = vld [vmem:[#allocation7 + $0xc4] sm:$0xf] }
  0xd1   :  { %v380_v57 = vrot.slane %v379_v46, 1  ;;  %v415_v61 = vadd.f32 %v414_v52, %v413_v41  ;;  %v2502_v6 = vor.u32 %v2970_v43, %v2501_v42  ;;  %1346 = vmatpush.bf16.msrb.mxu1 %v2374_v63  ;;  %v2630_v14 = vor.u32 %v3002_v49, %v2629_v48  ;;  %v2327_v38 = vld [vmem:[#allocation7 + $0xd0] sm:$0xf0]  ;;  %v2956_v44 = vld [vmem:[#allocation7 + $0x1c4] sm:$0xf] }
  0xd2   :  { %v437_v60 = vsub.f32 %v429_v50, %v433_v51  ;;  %v438_v1 = vsub.f32 %v430_v55, %v434_v56  ;;  %v2230_v15 = vor.u32 %v2902_v59, %v2229_v54  ;;  %v387_v25 = vrot.slane %v386_v4, 1  ;;  %v2988_v51 = vld [vmem:[#allocation7 + $0x2c4] sm:$0xf]  ;;  %v2583_v52 = vld [vmem:[#allocation7 + $0x2d0] sm:$0xf0] }
  0xd3   :  { %v381_v3 = vadd.f32 %v380_v57, %v379_v46  ;;  %v416_v13 = vrot.slane %v415_v61, 1  ;;  %v421_v26 = vrot.slane %v420_v62, 2  ;;  %1360 = vmatpush.bf16.msrb.mxu2 %v2502_v6  ;;  %1374 = vmatpush.bf16.msrb.mxu3 %v2630_v14  ;;  %v2358_v42 = vor.u32 %v2934_v8, %v2357_v7  ;;  %v2455_v46 = vld [vmem:[#allocation7 + $0x1d0] sm:$0xf0]  ;;  %v3020_v57 = vld [vmem:[#allocation7 + $0x3c4] sm:$0xf] }
  0xd4   :  { %v3345_v12 = vadd.f32 1e-05, %v437_v60  ;;  %v3347_v22 = vadd.f32 1e-05, %v438_v1  ;;  %1333 = vmatpush.bf16.msrb.mxu0 %v2230_v15  ;;  %v388_v34 = vadd.f32 %v387_v25, %v386_v4  ;;  %v2486_v43 = vor.u32 %v2966_v11, %v2485_v10  ;;  %v2711_v58 = vld [vmem:[#allocation7 + $0x3d0] sm:$0xf0] }
  0xd5   :  { %v3349_v24 = vmul.f32 0.125, %v381_v3  ;;  %v417_v27 = vadd.f32 %v416_v13, %v415_v61  ;;  %v422_v41 = vadd.f32 %v421_v26, %v420_v62  ;;  %v2614_v48 = vor.u32 %v2998_v17, %v2613_v16  ;;  %1347 = vmatpush.bf16.msrb.mxu1 %v2358_v42  ;;  %v2920_v60 = vld [vmem:[#allocation7 + $0xa4] sm:$0xf]  ;;  %v2311_v4 = vld [vmem:[#allocation7 + $0xb0] sm:$0xf0] }
  0xd6   :  { %3072 = vrsqrt.f32 %v3345_v12  ;;  %v3355_v47 = vmul.f32 0.125, %v388_v34  ;;  %v2346_v49 = vor.u32 %v2928_v18, %v2343_v19  ;;  %v2474_v50 = vor.u32 %v2960_v20, %v2471_v21  ;;  %v2952_v6 = vld [vmem:[#allocation7 + $0x1a4] sm:$0xf]  ;;  %v2439_v11 = vld [vmem:[#allocation7 + $0x1b0] sm:$0xf0] }
  0xd7   :  { %3074 = vrsqrt.f32 %v3347_v22  ;;  %v435_v33 = vmul.f32 %v3349_v24, %v3349_v24  ;;  %v431_v39 = vmul.f32 0.125, %v417_v27  ;;  %v423_v54 = vrot.slane %v422_v41, 1  ;;  %1361 = vmatpush.bf16.msrb.mxu2 %v2486_v43  ;;  %1375 = vmatpush.bf16.msrb.mxu3 %v2614_v48  ;;  %v2984_v13 = vld [vmem:[#allocation7 + $0x2a4] sm:$0xf]  ;;  %v2567_v14 = vld [vmem:[#allocation7 + $0x2b0] sm:$0xf0] }
  0xd8   :  { %v2602_v55 = vor.u32 %v2992_v30, %v2599_v31  ;;  %v2730_v56 = vor.u32 %v3024_v32, %v2727_v35  ;;  %1382 = vmatpush.bf16.msra.mxu0 %v2346_v49  ;;  %v2330_v59 = vor.u32 %v2924_v37, %v2327_v38  ;;  %v2458_v1 = vor.u32 %v2956_v44, %v2455_v46  ;;  %v3016_v16 = vld [vmem:[#allocation7 + $0x3a4] sm:$0xf]  ;;  %v2695_v17 = vld [vmem:[#allocation7 + $0x3b0] sm:$0xf0] }
  0xd9   :  { %v439_v53 = vsub.f32 %v431_v39, %v435_v33  ;;  %v424_v63 = vadd.f32 %v423_v54, %v422_v41  ;;  %1396 = vmatpush.bf16.msra.mxu1 %v2474_v50  ;;  %v2586_v3 = vor.u32 %v2988_v51, %v2583_v52  ;;  %v436_v8 = vmul.f32 %v3355_v47, %v3355_v47  ;;  %v2916_v27 = vld [vmem:[#allocation7 + $0x84] sm:$0xf]  ;;  %v2295_v30 = vld [vmem:[#allocation7 + $0x90] sm:$0xf0] }
  0xda   :  { %v2714_v10 = vor.u32 %v3020_v57, %v2711_v58  ;;  %v2314_v20 = vor.u32 %v2920_v60, %v2311_v4  ;;  %v2442_v25 = vor.u32 %v2952_v6, %v2439_v11  ;;  %v2570_v26 = vor.u32 %v2984_v13, %v2567_v14  ;;  %v2948_v31 = vld [vmem:[#allocation7 + $0x184] sm:$0xf]  ;;  %v2423_v34 = vld [vmem:[#allocation7 + $0x190] sm:$0xf0] }
  0xdb   :  { %v3359_v62 = vadd.f32 1e-05, %v439_v53  ;;  %1410 = vmatpush.bf16.msra.mxu2 %v2602_v55  ;;  %1424 = vmatpush.bf16.msra.mxu3 %v2730_v56  ;;  %v432_v19 = vmul.f32 0.125, %v424_v63  ;;  %v2698_v33 = vor.u32 %v3016_v16, %v2695_v17  ;;  %v2980_v35 = vld [vmem:[#allocation7 + $0x284] sm:$0xf]  ;;  %v2298_v44 = vor.u32 %v2916_v27, %v2295_v30 }
  0xdc   :  { %v3357_v61 = vpop.eup %3072  ;;  %1383 = vmatpush.bf16.msra.mxu0 %v2330_v59  ;;  %v2551_v37 = vld [vmem:[#allocation7 + $0x290] sm:$0xf0]  ;;  %v3012_v39 = vld [vmem:[#allocation7 + $0x384] sm:$0xf]  ;;  %v2426_v48 = vor.u32 %v2948_v31, %v2423_v34  ;;  %vm461_vm1 = vweird.f32 %v3347_v22  ;;  %vm451_vm7 = vweird.f32 %v3345_v12 }
  0xdd   :  { %v3361_v7 = vpop.eup %3074  ;;  %3076 = vrsqrt.f32 %v3359_v62  ;;  %v446_v18 = vmul.f32 %v3357_v61, %v3345_v12  ;;  %1397 = vmatpush.bf16.msra.mxu1 %v2458_v1  ;;  %v440_v32 = vsub.f32 %v432_v19, %v436_v8  ;;  %v2679_v41 = vld [vmem:[#allocation7 + $0x390] sm:$0xf0]  ;;  %v2554_v49 = vor.u32 %v2980_v35, %v2551_v37  ;;  %v2912_v50 = vld [vmem:[#allocation7 + $0x64] sm:$0xf] }
  0xde   :  { %v456_v15 = vmul.f32 %v3361_v7, %v3347_v22  ;;  %v2279_v51 = vld [vmem:[#allocation7 + $0x70] sm:$0xf0]  ;;  %v2944_v52 = vld [vmem:[#allocation7 + $0x164] sm:$0xf]  ;;  %v2682_v54 = vor.u32 %v3012_v39, %v2679_v41  ;;  %vm462_vm0 = vweird.f32 %v3361_v7  ;;  %vm471_vm4 = vweird.f32 %v3359_v62 }
  0xdf   :  { %1411 = vmatpush.bf16.msra.mxu2 %v2586_v3  ;;  %1425 = vmatpush.bf16.msra.mxu3 %v2714_v10  ;;  %v447_v42 = vmul.f32 %v3357_v61, %v446_v18  ;;  %v3372_v43 = vadd.f32 1e-05, %v440_v32  ;;  %v2407_v55 = vld [vmem:[#allocation7 + $0x170] sm:$0xf0]  ;;  %v2976_v56 = vld [vmem:[#allocation7 + $0x264] sm:$0xf]  ;;  %v2282_v4 = vor.u32 %v2912_v50, %v2279_v51  ;;  %vm3391_vm2 = vmor %vm461_vm1, %vm462_vm0  ;;  %vm452_vm6 = vweird.f32 %v3357_v61 }
  0xe0   :  { %v457_v21 = vmul.f32 %v3361_v7, %v456_v15  ;;  %1384 = vmatpush.bf16.msra.mxu0 %v2314_v20  ;;  %v2535_v57 = vld [vmem:[#allocation7 + $0x270] sm:$0xf0]  ;;  %v3008_v59 = vld [vmem:[#allocation7 + $0x364] sm:$0xf]  ;;  %v2410_v8 = vor.u32 %v2944_v52, %v2407_v55  ;;  %vm3420_vm8 = vmor %vm451_vm7, %vm452_vm6 }
  0xe1   :  { %1398 = vmatpush.bf16.msra.mxu1 %v2442_v25  ;;  %3078 = vrsqrt.f32 %v3372_v43  ;;  %v2663_v60 = vld [vmem:[#allocation7 + $0x370] sm:$0xf0]  ;;  %v3379_v63 = vld [vmem:[#allocation10] ss:$8 sm:$0xf]  ;;  %v448_v1 = vmul.f32 0.5, %v447_v42  ;;  %v2538_v10 = vor.u32 %v2976_v56, %v2535_v57  ;;  %vm481_vm10 = vweird.f32 %v3372_v43 }
  0xe2   :  { %v458_v38 = vmul.f32 0.5, %v457_v21  ;;  %v2908_v6 = vld [vmem:[#allocation7 + $0x44] sm:$0xf]  ;;  %v2263_v11 = vld [vmem:[#allocation7 + $0x50] sm:$0xf0]  ;;  %v2666_v16 = vor.u32 %v3008_v59, %v2663_v60  ;;  %v487_v20 = vperm.slane %v3379_v63, 1 }
  0xe3   :  { %v3374_v46 = vpop.eup %3076  ;;  %1412 = vmatpush.bf16.msra.mxu2 %v2570_v26  ;;  %1426 = vmatpush.bf16.msra.mxu3 %v2698_v33  ;;  %v2940_v13 = vld [vmem:[#allocation7 + $0x144] sm:$0xf]  ;;  %v2391_v14 = vld [vmem:[#allocation7 + $0x150] sm:$0xf0]  ;;  %v488_v21 = vperm.slane %v3379_v63, 2  ;;  %v449_v30 = vsub.f32 1.5, %v448_v1  ;;  %v2266_v22 = vor.u32 %v2908_v6, %v2263_v11 }
  0xe4   :  { %v466_v53 = vmul.f32 %v3374_v46, %v3359_v62  ;;  %v459_v58 = vsub.f32 1.5, %v458_v38  ;;  %1385 = vmatpush.bf16.msra.mxu0 %v2298_v44  ;;  %v2972_v17 = vld [vmem:[#allocation7 + $0x244] sm:$0xf]  ;;  %v2519_v18 = vld [vmem:[#allocation7 + $0x250] sm:$0xf0]  ;;  %vm472_vm3 = vweird.f32 %v3374_v46  ;;  %v2394_v34 = vor.u32 %v2940_v13, %v2391_v14 }
  0xe5   :  { %1399 = vmatpush.bf16.msra.mxu1 %v2426_v48  ;;  %v3004_v25 = vld [vmem:[#allocation7 + $0x344] sm:$0xf]  ;;  %v2647_v26 = vld [vmem:[#allocation7 + $0x350] sm:$0xf0]  ;;  %v2522_v35 = vor.u32 %v2972_v17, %v2519_v18  ;;  %vm3405_vm5 = vmor %vm471_vm4, %vm472_vm3  ;;  %v450_v62 = vmul.f32 %v3357_v61, %v449_v30  ;;  %v489_v17 = vperm.slane %v3379_v63, 3 }
  0xe6   :  { %v467_v3 = vmul.f32 %v3374_v46, %v466_v53  ;;  %v460_v19 = vmul.f32 %v3361_v7, %v459_v58  ;;  %v2904_v37 = vld [vmem:[#allocation7 + $0x24] sm:$0xf]  ;;  %v2247_v38 = vld [vmem:[#allocation7 + $0x30] sm:$0xf0]  ;;  %v2650_v42 = vor.u32 %v3004_v25, %v2647_v26 }
  0xe7   :  { %1413 = vmatpush.bf16.msra.mxu2 %v2554_v49  ;;  %1427 = vmatpush.bf16.msra.mxu3 %v2682_v54  ;;  %v3387_v27 = vpop.eup %3078  ;;  %v2936_v39 = vld [vmem:[#allocation7 + $0x124] sm:$0xf]  ;;  %v2375_v44 = vld [vmem:[#allocation7 + $0x130] sm:$0xf0]  ;;  %v454_v12 = vsel %vm3420_vm8, %v3357_v61, %v450_v62 }
  0xe8   :  { %v468_v15 = vmul.f32 0.5, %v467_v3  ;;  %1386 = vmatpush.bf16.msra.mxu0 %v2282_v4  ;;  %v476_v33 = vmul.f32 %v3387_v27, %v3372_v43  ;;  %v2968_v48 = vld [vmem:[#allocation7 + $0x224] sm:$0xf]  ;;  %v2503_v49 = vld [vmem:[#allocation7 + $0x230] sm:$0xf0]  ;;  %v464_v50 = vsel %vm3391_vm2, %v3361_v7, %v460_v19  ;;  %v2250_v7 = vor.u32 %v2904_v37, %v2247_v38 }
  0xe9   :  { %1400 = vmatpush.bf16.msra.mxu1 %v2410_v8  ;;  %v3000_v53 = vld [vmem:[#allocation7 + $0x324] sm:$0xf]  ;;  %v2631_v54 = vld [vmem:[#allocation7 + $0x330] sm:$0xf0]  ;;  %v2378_v58 = vor.u32 %v2936_v39, %v2375_v44  ;;  %v2506_v59 = vor.u32 %v2968_v48, %v2503_v49  ;;  %v495_v3 = vmul.f32 %v487_v20, %v464_v50  ;;  %vm482_vm9 = vweird.f32 %v3387_v27 }
  0xea   :  { %v469_v32 = vsub.f32 1.5, %v468_v15  ;;  %v477_v52 = vmul.f32 %v3387_v27, %v476_v33  ;;  %v2900_v56 = vld [vmem:[#allocation7 + $0x4] sm:$0xf]  ;;  %v2231_v60 = vld [vmem:[#allocation7 + $0x10] sm:$0xf0]  ;;  %v2634_v6 = vor.u32 %v3000_v53, %v2631_v54  ;;  %vm483_vm11 = vmor %vm481_vm10, %vm482_vm9 }
  0xeb   :  { %1414 = vmatpush.bf16.msra.mxu2 %v2538_v10  ;;  %1428 = vmatpush.bf16.msra.mxu3 %v2666_v16  ;;  %v2932_v1 = vld [vmem:[#allocation7 + $0x104] sm:$0xf]  ;;  %v2359_v8 = vld [vmem:[#allocation7 + $0x110] sm:$0xf0]  ;;  %v486_v16 = vperm.slane %v3379_v63, 0  ;;  %v2234_v18 = vor.u32 %v2900_v56, %v2231_v60  ;;  %v499_v25 = vmul.f32 %v495_v3, %v3339_v45  ;;  %v518_v38 = vperm.slane %v495_v3, 0 }
  0xec   :  { %v470_v41 = vmul.f32 %v3374_v46, %v469_v32  ;;  %1387 = vmatpush.bf16.msra.mxu0 %v2266_v22  ;;  %v478_v57 = vmul.f32 0.5, %v477_v52  ;;  %v2964_v10 = vld [vmem:[#allocation7 + $0x204] sm:$0xf]  ;;  %v2615_v15 = vld [vmem:[#allocation7 + $0x310] sm:$0xf0]  ;;  %v2362_v20 = vor.u32 %v2932_v1, %v2359_v8 }
  0xed   :  { %1401 = vmatpush.bf16.msra.mxu1 %v2394_v34  ;;  %v2996_v14 = vld [vmem:[#allocation7 + $0x304] sm:$0xf]  ;;  %v494_v30 = vmul.f32 %v486_v16, %v454_v12  ;;  %v506_v43 = vrot.slane %v499_v25, 7  ;;  %v99_v34 = vld [vmem:[#allocation10 + $0x1] ss:$8 sm:$0xf]  ;;  %v522_v53 = vmul.f32 %v518_v38, %v3299_v5  ;;  %v526_v54 = vmul.f32 %v518_v38, %v3313_v36 }
  0xee   :  { %v474_v55 = vsel %vm3405_vm5, %v3374_v46, %v470_v41  ;;  %v2487_v46 = vld [vmem:[#allocation7 + $0x210] sm:$0xf0]  ;;  %v479_v13 = vsub.f32 1.5, %v478_v57  ;;  %v2618_v61 = vor.u32 %v2996_v14, %v2615_v15  ;;  %v2995_v5 = vld [vmem:[#allocation7 + $0x2f4] sm:$0xf0] }
  0xef   :  { %1415 = vmatpush.bf16.msra.mxu2 %v2522_v35  ;;  %v3416_v4 = vmul.f32 %v488_v21, %v474_v55  ;;  %1429 = vmatpush.bf16.msra.mxu3 %v2650_v42  ;;  %v2490_v21 = vor.u32 %v2964_v10, %v2487_v46  ;;  %v498_v45 = vmul.f32 %v494_v30, %v3337_v40  ;;  %v517_v33 = vperm.slane %v494_v30, 0  ;;  %v2589_v30 = vld [vmem:[#allocation7 + $0x2c8] sm:$0xf] }
  0xf0   :  { %1388 = vmatpush.bf16.msra.mxu0 %v2250_v7  ;;  %v480_v19 = vmul.f32 %v3387_v27, %v479_v13  ;;  %v2349_v7 = vld [vmem:[#allocation7 + $0xe8] sm:$0xf] }
  0xf1   :  { %1402 = vmatpush.bf16.msra.mxu1 %v2378_v58  ;;  %v500_v26 = vmul.f32 %v3416_v4, %v3349_v24  ;;  %v519_v39 = vperm.slane %v3416_v4, 0  ;;  %v521_v44 = vmul.f32 %v517_v33, %v3297_v0  ;;  %v2477_v58 = vld [vmem:[#allocation7 + $0x1e8] sm:$0xf] }
  0xf2   :  { %v484_v63 = vsel %vm483_vm11, %v3387_v27, %v480_v19  ;;  %v510_v27 = vsel %vm509_vm12, %v498_v45, %v506_v43  ;;  %v2605_v4 = vld [vmem:[#allocation7 + $0x2e8] sm:$0xf]  ;;  %v2927_v19 = vld [vmem:[#allocation7 + $0xd4] sm:$0xf0] }
  0xf3   :  { %1416 = vmatpush.bf16.msra.mxu2 %v2506_v59  ;;  %1430 = vmatpush.bf16.msra.mxu3 %v2634_v6  ;;  %v497_v31 = vmul.f32 %v489_v17, %v484_v63  ;;  %v507_v32 = vrot.slane %v500_v26, 6  ;;  %v523_v62 = vmul.f32 %v519_v39, %v3303_v23  ;;  %v527_v55 = vmul.f32 %v519_v39, %v3321_v2  ;;  %v2733_v6 = vld [vmem:[#allocation7 + $0x3e8] sm:$0xf]  ;;  %v3027_v2 = vld [vmem:[#allocation7 + $0x3f4] sm:$0xf0] }
  0xf4   :  { %1389 = vmatpush.bf16.msra.mxu0 %v2234_v18  ;;  %v2333_v18 = vld [vmem:[#allocation7 + $0xc8] sm:$0xf]  ;;  %v2606_v25 = vor.u32 %v2995_v5, %v2605_v4  ;;  %v2734_v26 = vor.u32 %v3027_v2, %v2733_v6  ;;  %v2959_v63 = vld [vmem:[#allocation7 + $0x1d4] sm:$0xf0] }
  0xf5   :  { %1403 = vmatpush.bf16.msra.mxu1 %v2362_v20  ;;  %v501_v22 = vmul.f32 %v497_v31, %v3355_v47  ;;  %v520_v35 = vperm.slane %v497_v31, 0  ;;  %v525_v47 = vmul.f32 %v517_v33, %v3307_v29  ;;  %v2991_v31 = vld [vmem:[#allocation7 + $0x2d4] sm:$0xf0]  ;;  %v2717_v43 = vld [vmem:[#allocation7 + $0x3c8] sm:$0xf] }
  0xf6   :  { %v2923_v33 = vld [vmem:[#allocation7 + $0xb4] sm:$0xf0]  ;;  %v2573_v38 = vld [vmem:[#allocation7 + $0x2a8] sm:$0xf] }
  0xf7   :  { %1417 = vmatpush.bf16.msra.mxu2 %v2490_v21  ;;  %1431 = vmatpush.bf16.msra.mxu3 %v2618_v61  ;;  %v508_v24 = vrot.slane %v501_v22, 5  ;;  %v524_v48 = vmul.f32 %v520_v35, %v3305_v28  ;;  %v528_v40 = vmul.f32 %v520_v35, %v3327_v9  ;;  %v2931_v28 = vld [vmem:[#allocation7 + $0xf4] sm:$0xf0]  ;;  %v2461_v61 = vld [vmem:[#allocation7 + $0x1c8] sm:$0xf]  ;;  %v2334_v22 = vor.u32 %v2927_v19, %v2333_v18 }
  0xf8   :  { %v2963_v9 = vld [vmem:[#allocation7 + $0x1f4] sm:$0xf0]  ;;  %v2350_v16 = vor.u32 %v2931_v28, %v2349_v7  ;;  %v2462_v45 = vor.u32 %v2959_v63, %v2461_v61  ;;  %v2269_v6 = vld [vmem:[#allocation7 + $0x48] sm:$0xf] }
  0xf9   :  { %v512_v37 = vsel %vm511_vm13, %v507_v32, %v508_v24  ;;  %v2478_v17 = vor.u32 %v2963_v9, %v2477_v58  ;;  %v3023_v32 = vld [vmem:[#allocation7 + $0x3d4] sm:$0xf0]  ;;  %v2317_v24 = vld [vmem:[#allocation7 + $0xa8] sm:$0xf] }
  0xfa   :  { %v514_v41 = vsel %vm513_vm14, %v510_v27, %v512_v37  ;;  %v2718_v35 = vor.u32 %v3023_v32, %v2717_v43  ;;  %v2445_v27 = vld [vmem:[#allocation7 + $0x1a8] sm:$0xf]  ;;  %v2955_v37 = vld [vmem:[#allocation7 + $0x1b4] sm:$0xf0] }
  0xfb   :  { %v516_v42 = vsub.f32 %v99_v34, %v514_v41  ;;  %v2590_v34 = vor.u32 %v2991_v31, %v2589_v30  ;;  %v2987_v39 = vld [vmem:[#allocation7 + $0x2b4] sm:$0xf0]  ;;  %v2701_v41 = vld [vmem:[#allocation7 + $0x3a8] sm:$0xf] }
  0xfc   :  { %v2413_v58 = vld [vmem:[#allocation7 + $0x168] sm:$0xf]  ;;  %v2947_v9 = vld [vmem:[#allocation7 + $0x174] sm:$0xf0] }
  0xfd   :  { %v533_v49 = vperm.slane %v516_v42, 3  ;;  %v530_v50 = vperm.slane %v516_v42, 0  ;;  %v531_v51 = vperm.slane %v516_v42, 1  ;;  %v532_v52 = vperm.slane %v516_v42, 2  ;;  %v3019_v42 = vld [vmem:[#allocation7 + $0x3b4] sm:$0xf0] }
  0xfe   :  { %v2414_v5 = vor.u32 %v2947_v9, %v2413_v58  ;;  %v2943_v2 = vld [vmem:[#allocation7 + $0x154] sm:$0xf0]  ;;  %v2253_v18 = vld [vmem:[#allocation7 + $0x28] sm:$0xf]  ;;  %v2957_v58 = vld [vmem:[#allocation7 + $0x1cc] sm:$0xf] }
  0xff   :  { %v541_v0 = vadd.f32 %v533_v49, %v524_v48  ;;  %v545_v56 = vadd.f32 %v533_v49, %v528_v40  ;;  %v538_v29 = vadd.f32 %v530_v50, %v521_v44  ;;  %v542_v57 = vadd.f32 %v530_v50, %v525_v47  ;;  %v2301_v48 = vld [vmem:[#allocation7 + $0x88] sm:$0xf]  ;;  %v2919_v40 = vld [vmem:[#allocation7 + $0x94] sm:$0xf0]  ;;  %v2463_v9 = vld [vmem:[#allocation7 + $0x1d8] sm:$0xf0] }
 0x100   :  { %v539_v59 = vadd.f32 %v531_v51, %v522_v53  ;;  %v543_v60 = vadd.f32 %v531_v51, %v526_v54  ;;  %v540_v1 = vadd.f32 %v532_v52, %v523_v62  ;;  %v544_v3 = vadd.f32 %v532_v52, %v527_v55  ;;  %v2429_v51 = vld [vmem:[#allocation7 + $0x188] sm:$0xf]  ;;  %v2951_v52 = vld [vmem:[#allocation7 + $0x194] sm:$0xf0] }
 0x101   :  { %v553_v36 = vmax.f32 %v545_v56, 0.0  ;;  %v546_v8 = vmax.f32 %v538_v29, 0.0  ;;  %v550_v23 = vmax.f32 %v542_v57, 0.0  ;;  %v549_v10 = vmax.f32 %v541_v0, 0.0  ;;  %v2557_v53 = vld [vmem:[#allocation7 + $0x288] sm:$0xf] }
 0x102   :  { %v547_v46 = vmax.f32 %v539_v59, 0.0  ;;  %v551_v11 = vmax.f32 %v543_v60, 0.0  ;;  %v548_v13 = vmax.f32 %v540_v1, 0.0  ;;  %v552_v14 = vmax.f32 %v544_v3, 0.0  ;;  %v2983_v54 = vld [vmem:[#allocation7 + $0x294] sm:$0xf0] }
 0x103   :  { %v3449_v15 = vpack.c.bf16 %v550_v23, %v546_v8  ;;  %v3451_v12 = vpack.c.bf16 %v553_v36, %v549_v10  ;;  %v2318_v44 = vor.u32 %v2923_v33, %v2317_v24  ;;  %v2446_v47 = vor.u32 %v2955_v37, %v2445_v27  ;;  %v2685_v62 = vld [vmem:[#allocation7 + $0x388] sm:$0xf]  ;;  %v3015_v55 = vld [vmem:[#allocation7 + $0x394] sm:$0xf0] }
 0x104   :  { %v3453_v20 = vpack.c.bf16 %v551_v11, %v547_v46  ;;  %v3455_v21 = vpack.c.bf16 %v552_v14, %v548_v13  ;;  %v2574_v49 = vor.u32 %v2987_v39, %v2573_v38  ;;  %v2702_v50 = vor.u32 %v3019_v42, %v2701_v41  ;;  %v2285_v56 = vld [vmem:[#allocation7 + $0x68] sm:$0xf]  ;;  %v2915_v29 = vld [vmem:[#allocation7 + $0x74] sm:$0xf0] }
 0x105   :  { %1334 = vmatmul.bf16.vlgmr.msrb.gmra.mxu0 %v3449_v15  ;;  %1376 = vmatmul.bf16.vlgmr.msrb.gmra.mxu3 %v3451_v12  ;;  %v2302_v7 = vor.u32 %v2919_v40, %v2301_v48  ;;  %v2430_v0 = vor.u32 %v2951_v52, %v2429_v51  ;;  %v2558_v57 = vor.u32 %v2983_v54, %v2557_v53  ;;  %v2541_v59 = vld [vmem:[#allocation7 + $0x268] sm:$0xf]  ;;  %v2979_v60 = vld [vmem:[#allocation7 + $0x274] sm:$0xf0]  ;;  %v2961_v48 = vld [vmem:[#allocation7 + $0x1ec] sm:$0xf] }
 0x106   :  { %1348 = vmatmul.bf16.vlgmr.msrb.gmra.mxu1 %v3453_v20  ;;  %1362 = vmatmul.bf16.vlgmr.msrb.gmra.mxu2 %v3455_v21  ;;  %v2686_v28 = vor.u32 %v3015_v55, %v2685_v62  ;;  %v2669_v1 = vld [vmem:[#allocation7 + $0x368] sm:$0xf]  ;;  %v3011_v3 = vld [vmem:[#allocation7 + $0x374] sm:$0xf0]  ;;  %v2286_v4 = vor.u32 %v2915_v29, %v2285_v56  ;;  %v2542_v8 = vor.u32 %v2979_v60, %v2541_v59  ;;  %v2479_v40 = vld [vmem:[#allocation7 + $0x1f8] sm:$0xf0] }
 0x107   :  { %1438 = vmatpush.bf16.msrb.mxu0 %v2350_v16  ;;  %1452 = vmatpush.bf16.msrb.mxu1 %v2478_v17  ;;  %v2911_v36 = vld [vmem:[#allocation7 + $0x54] sm:$0xf0]  ;;  %v2670_v23 = vor.u32 %v3011_v3, %v2669_v1  ;;  %v2397_v10 = vld [vmem:[#allocation7 + $0x148] sm:$0xf]  ;;  %v2607_v52 = vld [vmem:[#allocation7 + $0x2f8] sm:$0xf0] }
 0x108   :  { %1466 = vmatpush.bf16.msrb.mxu2 %v2606_v25  ;;  %1480 = vmatpush.bf16.msrb.mxu3 %v2734_v26  ;;  %v2525_v46 = vld [vmem:[#allocation7 + $0x248] sm:$0xf]  ;;  %v2975_v11 = vld [vmem:[#allocation7 + $0x254] sm:$0xf0]  ;;  %v2270_v16 = vor.u32 %v2911_v36, %v2269_v6  ;;  %v2398_v17 = vor.u32 %v2943_v2, %v2397_v10  ;;  %v3025_v53 = vld [vmem:[#allocation7 + $0x3ec] sm:$0xf] }
 0x109   :  { %v2653_v13 = vld [vmem:[#allocation7 + $0x348] sm:$0xf]  ;;  %v3007_v14 = vld [vmem:[#allocation7 + $0x354] sm:$0xf0]  ;;  %v2526_v25 = vor.u32 %v2975_v11, %v2525_v46  ;;  %v2735_v54 = vld [vmem:[#allocation7 + $0x3f8] sm:$0xf0] }
 0x10a   :  { %v2907_v19 = vld [vmem:[#allocation7 + $0x34] sm:$0xf0]  ;;  %v2654_v26 = vor.u32 %v3007_v14, %v2653_v13  ;;  %v2381_v61 = vld [vmem:[#allocation7 + $0x128] sm:$0xf]  ;;  %v2925_v56 = vld [vmem:[#allocation7 + $0xcc] sm:$0xf] }
 0x10b   :  { %1439 = vmatpush.bf16.msrb.mxu0 %v2334_v22  ;;  %1453 = vmatpush.bf16.msrb.mxu1 %v2462_v45  ;;  %v2939_v63 = vld [vmem:[#allocation7 + $0x134] sm:$0xf0]  ;;  %v2509_v30 = vld [vmem:[#allocation7 + $0x228] sm:$0xf]  ;;  %v2254_v45 = vor.u32 %v2907_v19, %v2253_v18  ;;  %v2335_v29 = vld [vmem:[#allocation7 + $0xd8] sm:$0xf0] }
 0x10c   :  { %1467 = vmatpush.bf16.msrb.mxu2 %v2590_v34  ;;  %1481 = vmatpush.bf16.msrb.mxu3 %v2718_v35  ;;  %v2971_v31 = vld [vmem:[#allocation7 + $0x234] sm:$0xf0]  ;;  %v2637_v43 = vld [vmem:[#allocation7 + $0x328] sm:$0xf]  ;;  %v2382_v24 = vor.u32 %v2939_v63, %v2381_v61  ;;  %v2989_v59 = vld [vmem:[#allocation7 + $0x2cc] sm:$0xf] }
 0x10d   :  { %v3003_v32 = vld [vmem:[#allocation7 + $0x334] sm:$0xf0]  ;;  %v2237_v22 = vld [vmem:[#allocation7 + $0x8] sm:$0xf]  ;;  %v2510_v27 = vor.u32 %v2971_v31, %v2509_v30  ;;  %v2591_v60 = vld [vmem:[#allocation7 + $0x2d8] sm:$0xf0] }
 0x10e   :  { %v2903_v33 = vld [vmem:[#allocation7 + $0x14] sm:$0xf0]  ;;  %v2365_v34 = vld [vmem:[#allocation7 + $0x108] sm:$0xf]  ;;  %v2638_v37 = vor.u32 %v3003_v32, %v2637_v43  ;;  %v3021_v1 = vld [vmem:[#allocation7 + $0x3cc] sm:$0xf] }
 0x10f   :  { %1440 = vmatpush.bf16.msrb.mxu0 %v2318_v44  ;;  %1454 = vmatpush.bf16.msrb.mxu1 %v2446_v47  ;;  %v2935_v35 = vld [vmem:[#allocation7 + $0x114] sm:$0xf0]  ;;  %v2493_v38 = vld [vmem:[#allocation7 + $0x208] sm:$0xf]  ;;  %v2929_v44 = vld [vmem:[#allocation7 + $0xec] sm:$0xf] }
 0x110   :  { %1468 = vmatpush.bf16.msrb.mxu2 %v2574_v49  ;;  %1482 = vmatpush.bf16.msrb.mxu3 %v2702_v50  ;;  %v2967_v39 = vld [vmem:[#allocation7 + $0x214] sm:$0xf0]  ;;  %v2621_v41 = vld [vmem:[#allocation7 + $0x308] sm:$0xf]  ;;  %v2351_v47 = vld [vmem:[#allocation7 + $0xf8] sm:$0xf0]  ;;  %v2238_v50 = vor.u32 %v2903_v33, %v2237_v22  ;;  %v2366_v51 = vor.u32 %v2935_v35, %v2365_v34 }
 0x111   :  { %v2999_v42 = vld [vmem:[#allocation7 + $0x314] sm:$0xf0]  ;;  %v2993_v49 = vld [vmem:[#allocation7 + $0x2ec] sm:$0xf]  ;;  %v2494_v62 = vor.u32 %v2967_v39, %v2493_v38  ;;  %v2719_v3 = vld [vmem:[#allocation7 + $0x3d8] sm:$0xf0] }
 0x112   :  { %v2622_v55 = vor.u32 %v2999_v42, %v2621_v41  ;;  %v2921_v6 = vld [vmem:[#allocation7 + $0xac] sm:$0xf]  ;;  %v2319_v36 = vld [vmem:[#allocation7 + $0xb8] sm:$0xf0] }
 0x113   :  { %1441 = vmatpush.bf16.msrb.mxu0 %v2302_v7  ;;  %1455 = vmatpush.bf16.msrb.mxu1 %v2430_v0  ;;  %v2354_v7 = vor.u32 %v2929_v44, %v2351_v47  ;;  %v2482_v0 = vor.u32 %v2961_v48, %v2479_v40  ;;  %v2953_v10 = vld [vmem:[#allocation7 + $0x1ac] sm:$0xf]  ;;  %v2447_v2 = vld [vmem:[#allocation7 + $0x1b8] sm:$0xf0] }
 0x114   :  { %1469 = vmatpush.bf16.msrb.mxu2 %v2558_v57  ;;  %1483 = vmatpush.bf16.msrb.mxu3 %v2686_v28  ;;  %v2610_v57 = vor.u32 %v2993_v49, %v2607_v52  ;;  %v2738_v28 = vor.u32 %v3025_v53, %v2735_v54  ;;  %v2985_v46 = vld [vmem:[#allocation7 + $0x2ac] sm:$0xf]  ;;  %v2575_v11 = vld [vmem:[#allocation7 + $0x2b8] sm:$0xf0] }
 0x115   :  { %1390 = vmatmul.bf16.vlgmr.msra.gmra.mxu0 %v3449_v15  ;;  %1432 = vmatmul.bf16.vlgmr.msra.gmra.mxu3 %v3451_v12  ;;  %v3017_v13 = vld [vmem:[#allocation7 + $0x3ac] sm:$0xf]  ;;  %v2703_v14 = vld [vmem:[#allocation7 + $0x3b8] sm:$0xf0] }
 0x116   :  { %1404 = vmatmul.bf16.vlgmr.msra.gmra.mxu1 %v3453_v20  ;;  %1418 = vmatmul.bf16.vlgmr.msra.gmra.mxu2 %v3455_v21  ;;  %v2917_v18 = vld [vmem:[#allocation7 + $0x8c] sm:$0xf]  ;;  %v2303_v19 = vld [vmem:[#allocation7 + $0x98] sm:$0xf0] }
 0x117   :  { %1442 = vmatpush.bf16.msrb.mxu0 %v2286_v4  ;;  %1456 = vmatpush.bf16.msrb.mxu1 %v2414_v5  ;;  %v2338_v4 = vor.u32 %v2925_v56, %v2335_v29  ;;  %v2466_v5 = vor.u32 %v2957_v58, %v2463_v9  ;;  %v2949_v61 = vld [vmem:[#allocation7 + $0x18c] sm:$0xf]  ;;  %v2431_v63 = vld [vmem:[#allocation7 + $0x198] sm:$0xf0]  ;;  %v2306_v22 = vor.u32 %v2917_v18, %v2303_v19 }
 0x118   :  { %1470 = vmatpush.bf16.msrb.mxu2 %v2542_v8  ;;  %1484 = vmatpush.bf16.msrb.mxu3 %v2670_v23  ;;  %v2594_v8 = vor.u32 %v2989_v59, %v2591_v60  ;;  %v2722_v23 = vor.u32 %v3021_v1, %v2719_v3  ;;  %v2981_v30 = vld [vmem:[#allocation7 + $0x28c] sm:$0xf]  ;;  %v2559_v31 = vld [vmem:[#allocation7 + $0x298] sm:$0xf0] }
 0x119   :  { %v3013_v43 = vld [vmem:[#allocation7 + $0x38c] sm:$0xf]  ;;  %v2687_v32 = vld [vmem:[#allocation7 + $0x398] sm:$0xf0]  ;;  %v2562_v34 = vor.u32 %v2981_v30, %v2559_v31 }
 0x11a   :  { %v2287_v33 = vld [vmem:[#allocation7 + $0x78] sm:$0xf0]  ;;  %v2690_v35 = vor.u32 %v3013_v43, %v2687_v32  ;;  %v2977_v38 = vld [vmem:[#allocation7 + $0x26c] sm:$0xf] }
 0x11b   :  { %1443 = vmatpush.bf16.msrb.mxu0 %v2270_v16  ;;  %1457 = vmatpush.bf16.msrb.mxu1 %v2398_v17  ;;  %v2322_v16 = vor.u32 %v2921_v6, %v2319_v36  ;;  %v2450_v17 = vor.u32 %v2953_v10, %v2447_v2  ;;  %v2543_v39 = vld [vmem:[#allocation7 + $0x278] sm:$0xf0]  ;;  %v3009_v41 = vld [vmem:[#allocation7 + $0x36c] sm:$0xf] }
 0x11c   :  { %1471 = vmatpush.bf16.msrb.mxu2 %v2526_v25  ;;  %1485 = vmatpush.bf16.msrb.mxu3 %v2654_v26  ;;  %v2578_v25 = vor.u32 %v2985_v46, %v2575_v11  ;;  %v2706_v26 = vor.u32 %v3017_v13, %v2703_v14  ;;  %v2671_v42 = vld [vmem:[#allocation7 + $0x378] sm:$0xf0]  ;;  %v2909_v48 = vld [vmem:[#allocation7 + $0x4c] sm:$0xf]  ;;  %v2546_v49 = vor.u32 %v2977_v38, %v2543_v39 }
 0x11d   :  { %v2271_v40 = vld [vmem:[#allocation7 + $0x58] sm:$0xf0]  ;;  %v2973_v53 = vld [vmem:[#allocation7 + $0x24c] sm:$0xf] }
 0x11e   :  { %v2399_v52 = vld [vmem:[#allocation7 + $0x158] sm:$0xf0]  ;;  %v2905_v56 = vld [vmem:[#allocation7 + $0x2c] sm:$0xf] }
 0x11f   :  { %1444 = vmatpush.bf16.msrb.mxu0 %v2254_v45  ;;  %1458 = vmatpush.bf16.msrb.mxu1 %v2382_v24  ;;  %v2434_v45 = vor.u32 %v2949_v61, %v2431_v63  ;;  %v2913_v24 = vld [vmem:[#allocation7 + $0x6c] sm:$0xf]  ;;  %v2527_v54 = vld [vmem:[#allocation7 + $0x258] sm:$0xf0] }
 0x120   :  { %1472 = vmatpush.bf16.msrb.mxu2 %v2510_v27  ;;  %1486 = vmatpush.bf16.msrb.mxu3 %v2638_v37  ;;  %v2945_v27 = vld [vmem:[#allocation7 + $0x16c] sm:$0xf]  ;;  %v2415_v37 = vld [vmem:[#allocation7 + $0x178] sm:$0xf0]  ;;  %v2290_v44 = vor.u32 %v2913_v24, %v2287_v33 }
 0x121   :  { %v2418_v47 = vor.u32 %v2945_v27, %v2415_v37  ;;  %v2255_v29 = vld [vmem:[#allocation7 + $0x38] sm:$0xf0]  ;;  %v2937_v58 = vld [vmem:[#allocation7 + $0x12c] sm:$0xf] }
 0x122   :  { %v2383_v9 = vld [vmem:[#allocation7 + $0x138] sm:$0xf0]  ;;  %v2969_v59 = vld [vmem:[#allocation7 + $0x22c] sm:$0xf] }
 0x123   :  { %1445 = vmatpush.bf16.msrb.mxu0 %v2238_v50  ;;  %1459 = vmatpush.bf16.msrb.mxu1 %v2366_v51  ;;  %v2674_v50 = vor.u32 %v3009_v41, %v2671_v42  ;;  %v2941_v51 = vld [vmem:[#allocation7 + $0x14c] sm:$0xf]  ;;  %v2511_v60 = vld [vmem:[#allocation7 + $0x238] sm:$0xf0] }
 0x124   :  { %1473 = vmatpush.bf16.msrb.mxu2 %v2494_v62  ;;  %1487 = vmatpush.bf16.msrb.mxu3 %v2622_v55  ;;  %v3005_v62 = vld [vmem:[#allocation7 + $0x34c] sm:$0xf]  ;;  %v2655_v55 = vld [vmem:[#allocation7 + $0x358] sm:$0xf0] }
 0x125   :  { %v3001_v1 = vld [vmem:[#allocation7 + $0x32c] sm:$0xf]  ;;  %v2639_v3 = vld [vmem:[#allocation7 + $0x338] sm:$0xf0] }
 0x126   :  { %1446 = vmatmul.bf16.vlgmr.msrb.gmra.mxu0 %v3449_v15  ;;  %1460 = vmatmul.bf16.vlgmr.msrb.gmra.mxu1 %v3453_v20  ;;  %v2901_v6 = vld [vmem:[#allocation7 + $0xc] sm:$0xf]  ;;  %v2239_v36 = vld [vmem:[#allocation7 + $0x18] sm:$0xf0] }
 0x127   :  { %1494 = vmatpush.bf16.msra.mxu0 %v2354_v7  ;;  %1508 = vmatpush.bf16.msra.mxu1 %v2482_v0  ;;  %v2274_v7 = vor.u32 %v2909_v48, %v2271_v40  ;;  %v2402_v0 = vor.u32 %v2941_v51, %v2399_v52  ;;  %v2933_v10 = vld [vmem:[#allocation7 + $0x10c] sm:$0xf]  ;;  %v2367_v2 = vld [vmem:[#allocation7 + $0x118] sm:$0xf0] }
 0x128   :  { %1522 = vmatpush.bf16.msra.mxu2 %v2610_v57  ;;  %1536 = vmatpush.bf16.msra.mxu3 %v2738_v28  ;;  %v2530_v57 = vor.u32 %v2973_v53, %v2527_v54  ;;  %v2658_v28 = vor.u32 %v3005_v62, %v2655_v55  ;;  %v2965_v46 = vld [vmem:[#allocation7 + $0x20c] sm:$0xf]  ;;  %v2495_v11 = vld [vmem:[#allocation7 + $0x218] sm:$0xf0] }
 0x129   :  { %1474 = vmatmul.bf16.vlgmr.msrb.gmra.mxu2 %v3455_v21  ;;  %1488 = vmatmul.bf16.vlgmr.msrb.gmra.mxu3 %v3451_v12  ;;  %v2997_v13 = vld [vmem:[#allocation7 + $0x30c] sm:$0xf]  ;;  %v2623_v14 = vld [vmem:[#allocation7 + $0x318] sm:$0xf0]  ;;  %v2498_v18 = vor.u32 %v2965_v46, %v2495_v11 }
 0x12a   :  { %v2626_v19 = vor.u32 %v2997_v13, %v2623_v14 }
 0x12b   :  { %1495 = vmatpush.bf16.msra.mxu0 %v2338_v4  ;;  %1509 = vmatpush.bf16.msra.mxu1 %v2466_v5  ;;  %v2258_v4 = vor.u32 %v2905_v56, %v2255_v29  ;;  %v2386_v5 = vor.u32 %v2937_v58, %v2383_v9 }
 0x12c   :  { %1523 = vmatpush.bf16.msra.mxu2 %v2594_v8  ;;  %1537 = vmatpush.bf16.msra.mxu3 %v2722_v23  ;;  %v2514_v8 = vor.u32 %v2969_v59, %v2511_v60  ;;  %v2642_v23 = vor.u32 %v3001_v1, %v2639_v3 }
 0x12f   :  { %1496 = vmatpush.bf16.msra.mxu0 %v2322_v16  ;;  %1510 = vmatpush.bf16.msra.mxu1 %v2450_v17  ;;  %v2242_v16 = vor.u32 %v2901_v6, %v2239_v36  ;;  %v2370_v17 = vor.u32 %v2933_v10, %v2367_v2 }
 0x130   :  { %1524 = vmatpush.bf16.msra.mxu2 %v2578_v25  ;;  %1538 = vmatpush.bf16.msra.mxu3 %v2706_v26 }
 0x133   :  { %1497 = vmatpush.bf16.msra.mxu0 %v2306_v22  ;;  %1511 = vmatpush.bf16.msra.mxu1 %v2434_v45 }
 0x134   :  { %1525 = vmatpush.bf16.msra.mxu2 %v2562_v34  ;;  %1539 = vmatpush.bf16.msra.mxu3 %v2690_v35 }
 0x137   :  { %1498 = vmatpush.bf16.msra.mxu0 %v2290_v44  ;;  %1512 = vmatpush.bf16.msra.mxu1 %v2418_v47 }
 0x138   :  { %1526 = vmatpush.bf16.msra.mxu2 %v2546_v49  ;;  %1540 = vmatpush.bf16.msra.mxu3 %v2674_v50 }
 0x13b   :  { %1499 = vmatpush.bf16.msra.mxu0 %v2274_v7  ;;  %1513 = vmatpush.bf16.msra.mxu1 %v2402_v0 }
 0x13c   :  { %1527 = vmatpush.bf16.msra.mxu2 %v2530_v57  ;;  %1541 = vmatpush.bf16.msra.mxu3 %v2658_v28 }
 0x13f   :  { %1500 = vmatpush.bf16.msra.mxu0 %v2258_v4  ;;  %1514 = vmatpush.bf16.msra.mxu1 %v2386_v5 }
 0x140   :  { %1528 = vmatpush.bf16.msra.mxu2 %v2514_v8  ;;  %1542 = vmatpush.bf16.msra.mxu3 %v2642_v23 }
 0x143   :  { %1501 = vmatpush.bf16.msra.mxu0 %v2242_v16  ;;  %1515 = vmatpush.bf16.msra.mxu1 %v2370_v17 }
 0x144   :  { %1529 = vmatpush.bf16.msra.mxu2 %v2498_v18  ;;  %1543 = vmatpush.bf16.msra.mxu3 %v2626_v19 }
 0x146   :  { %1502 = vmatmul.bf16.vlgmr.msra.gmra.mxu0 %v3449_v15  ;;  %1516 = vmatmul.bf16.vlgmr.msra.gmra.mxu1 %v3453_v20 }
 0x147   :  { %1530 = vmatmul.bf16.vlgmr.msra.gmra.mxu2 %v3455_v21  ;;  %1544 = vmatmul.bf16.vlgmr.msra.gmra.mxu3 %v3451_v12 }
 0x182   :  { %v1335_v25 = vpop.f32.mrf.mxu0 }
 0x183   :  { %v1349_v26 = vpop.f32.mrf.mxu1 }
 0x184   :  { %v1350_v43 = vadd.f32 %v1349_v26, %v1335_v25 }
 0x188   :  { %v1377_v61 = vpop.f32.mrf.mxu3 }
 0x189   :  { %v1363_v63 = vpop.f32.mrf.mxu2 }
 0x18a   :  { %v1337_v30 = vpop.f32.mrf.mxu0  ;;  %v1364_v32 = vadd.f32 %v1363_v63, %v1350_v43 }
 0x18b   :  { %v1351_v31 = vpop.f32.mrf.mxu1 }
 0x18c   :  { %v1352_v22 = vadd.f32 %v1351_v31, %v1337_v30  ;;  %v3473_v33 = vadd.f32 %v1377_v61, %v1364_v32 }
 0x18e   :  { %v1578_v12 = vmul.f32 %v3473_v33, %v3473_v33 }
 0x190   :  { %v1379_v45 = vpop.f32.mrf.mxu3 }
 0x191   :  { %v1365_v24 = vpop.f32.mrf.mxu2 }
 0x192   :  { %v1366_v15 = vadd.f32 %v1365_v24, %v1352_v22  ;;  %v1391_v34 = vpop.f32.mrf.mxu0 }
 0x193   :  { %v1405_v20 = vpop.f32.mrf.mxu1 }
 0x194   :  { %v3475_v35 = vadd.f32 %v1379_v45, %v1366_v15  ;;  %v1406_v47 = vadd.f32 %v1405_v20, %v1391_v34 }
 0x196   :  { %v1550_v21 = vadd.f32 %v3475_v35, %v3473_v33  ;;  %v1582_v27 = vmul.f32 %v3475_v35, %v3475_v35  ;;  %v1614_v28 = vmul.f32 8.0, %v3475_v35 }
 0x198   :  { %v1551_v37 = vrot.slane %v1550_v21, 4  ;;  %v1586_v38 = vadd.f32 %v1582_v27, %v1578_v12  ;;  %v1433_v39 = vpop.f32.mrf.mxu3  ;;  %v1622_v60 = vmul.f32 8.0, %v1582_v27 }
 0x199   :  { %v1419_v41 = vpop.f32.mrf.mxu2 }
 0x19a   :  { %v1552_v42 = vadd.f32 %v1551_v37, %v1550_v21  ;;  %v1587_v44 = vrot.slane %v1586_v38, 4  ;;  %v1393_v48 = vpop.f32.mrf.mxu0  ;;  %v1420_v51 = vadd.f32 %v1419_v41, %v1406_v47 }
 0x19b   :  { %v1407_v40 = vpop.f32.mrf.mxu1 }
 0x19c   :  { %v1553_v49 = vrot.slane %v1552_v42, 2  ;;  %v1588_v50 = vadd.f32 %v1587_v44, %v1586_v38  ;;  %v1408_v55 = vadd.f32 %v1407_v40, %v1393_v48  ;;  %v3483_v7 = vadd.f32 %v1433_v39, %v1420_v51 }
 0x19e   :  { %v1554_v52 = vadd.f32 %v1553_v49, %v1552_v42  ;;  %v1589_v53 = vrot.slane %v1588_v50, 2  ;;  %v1579_v3 = vmul.f32 %v3483_v7, %v3483_v7 }
 0x1a0   :  { %v1555_v54 = vrot.slane %v1554_v52, 1  ;;  %v1590_v62 = vadd.f32 %v1589_v53, %v1588_v50  ;;  %v1435_v56 = vpop.f32.mrf.mxu3 }
 0x1a1   :  { %v1421_v0 = vpop.f32.mrf.mxu2 }
 0x1a2   :  { %v1556_v29 = vadd.f32 %v1555_v54, %v1554_v52  ;;  %v1591_v57 = vrot.slane %v1590_v62, 1  ;;  %v1422_v58 = vadd.f32 %v1421_v0, %v1408_v55 }
 0x1a3   :  { %v1447_v4 = vpop.f32.mrf.mxu0  ;;  %v1461_v5 = vpop.f32.mrf.mxu1 }
 0x1a4   :  { %v1592_v9 = vadd.f32 %v1591_v57, %v1590_v62  ;;  %v1618_v59 = vsub.f32 %v1556_v29, %v1614_v28  ;;  %v3486_v1 = vadd.f32 %v1435_v56, %v1422_v58  ;;  %v1462_v61 = vadd.f32 %v1461_v5, %v1447_v4  ;;  %v3513_v62 = vld [vmem:[#allocation10 + $0x2] ss:$8 sm:$0xf] }
 0x1a5   :  { %v1691_v28 = vperm.slane %v3513_v62, 0 }
 0x1a6   :  { %v1626_v6 = vsub.f32 %v1592_v9, %v1622_v60  ;;  %v3490_v36 = vmul.f32 0.125, %v1618_v59  ;;  %v1557_v8 = vadd.f32 %v3486_v1, %v3483_v7  ;;  %v1583_v23 = vmul.f32 %v3486_v1, %v3486_v1 }
 0x1a7   :  { %v1615_v34 = vmul.f32 8.0, %v3486_v1 }
 0x1a8   :  { %v1634_v10 = vmul.f32 0.125, %v1626_v6  ;;  %v1638_v2 = vmul.f32 %v3490_v36, %v3490_v36  ;;  %v1558_v46 = vrot.slane %v1557_v8, 4  ;;  %v1593_v11 = vadd.f32 %v1583_v23, %v1579_v3 }
 0x1a9   :  { %v1623_v39 = vmul.f32 8.0, %v1583_v23 }
 0x1aa   :  { %v1642_v13 = vsub.f32 %v1634_v10, %v1638_v2  ;;  %v1559_v14 = vadd.f32 %v1558_v46, %v1557_v8  ;;  %v1594_v16 = vrot.slane %v1593_v11, 4 }
 0x1ab   :  { %v1449_v43 = vpop.f32.mrf.mxu0  ;;  %v1463_v32 = vpop.f32.mrf.mxu1 }
 0x1ac   :  { %v1475_v17 = vpop.f32.mrf.mxu2  ;;  %v1489_v18 = vpop.f32.mrf.mxu3  ;;  %v1646_v19 = vadd.f32 1e-05, %v1642_v13  ;;  %v1560_v25 = vrot.slane %v1559_v14, 2  ;;  %v1595_v26 = vadd.f32 %v1594_v16, %v1593_v11  ;;  %v1464_v20 = vadd.f32 %v1463_v32, %v1449_v43 }
 0x1ad   :  { %v1476_v31 = vadd.f32 %v1475_v17, %v1462_v61 }
 0x1ae   :  { %3080 = vrsqrt.f32 %v1646_v19  ;;  %v1561_v63 = vadd.f32 %v1560_v25, %v1559_v14  ;;  %v1596_v30 = vrot.slane %v1595_v26, 2  ;;  %vm1656_vm0 = vweird.f32 %v1646_v19 }
 0x1af   :  { %v3499_v12 = vadd.f32 %v1489_v18, %v1476_v31 }
 0x1b0   :  { %v1562_v22 = vrot.slane %v1561_v63, 1  ;;  %v1597_v45 = vadd.f32 %v1596_v30, %v1595_v26 }
 0x1b1   :  { %v1580_v50 = vmul.f32 %v3499_v12, %v3499_v12 }
 0x1b2   :  { %v1563_v24 = vadd.f32 %v1562_v22, %v1561_v63  ;;  %v1598_v15 = vrot.slane %v1597_v45, 1 }
 0x1b4   :  { %v1477_v21 = vpop.f32.mrf.mxu2  ;;  %v3081_v27 = vpop.eup %3080  ;;  %v1599_v37 = vadd.f32 %v1598_v15, %v1597_v45  ;;  %v1619_v38 = vsub.f32 %v1563_v24, %v1615_v34 }
 0x1b5   :  { %v1478_v41 = vadd.f32 %v1477_v21, %v1464_v20  ;;  %v1651_v42 = vmul.f32 %v3081_v27, %v1646_v19  ;;  %v1491_v44 = vpop.f32.mrf.mxu3  ;;  %vm1657_vm15 = vweird.f32 %v3081_v27 }
 0x1b6   :  { %v1627_v47 = vsub.f32 %v1599_v37, %v1623_v39  ;;  %v3501_v48 = vmul.f32 0.125, %v1619_v38  ;;  %vm1658_vm1 = vmor %vm1656_vm0, %vm1657_vm15 }
 0x1b7   :  { %v3503_v40 = vadd.f32 %v1491_v44, %v1478_v41  ;;  %v1652_v49 = vmul.f32 %v3081_v27, %v1651_v42 }
 0x1b8   :  { %v1635_v51 = vmul.f32 0.125, %v1627_v47  ;;  %v1639_v52 = vmul.f32 %v3501_v48, %v3501_v48 }
 0x1b9   :  { %v1564_v53 = vadd.f32 %v3503_v40, %v3499_v12  ;;  %v1584_v54 = vmul.f32 %v3503_v40, %v3503_v40  ;;  %v1653_v55 = vmul.f32 0.5, %v1652_v49  ;;  %v1616_v16 = vmul.f32 8.0, %v3503_v40 }
 0x1ba   :  { %v1643_v0 = vsub.f32 %v1635_v51, %v1639_v52 }
 0x1bb   :  { %v1565_v56 = vrot.slane %v1564_v53, 4  ;;  %v1600_v29 = vadd.f32 %v1584_v54, %v1580_v50  ;;  %v1654_v57 = vsub.f32 1.5, %v1653_v55  ;;  %v1624_v30 = vmul.f32 8.0, %v1584_v54 }
 0x1bc   :  { %v1647_v58 = vadd.f32 1e-05, %v1643_v0 }
 0x1bd   :  { %v1566_v9 = vadd.f32 %v1565_v56, %v1564_v53  ;;  %v1601_v59 = vrot.slane %v1600_v29, 4  ;;  %v1655_v60 = vmul.f32 %v3081_v27, %v1654_v57  ;;  %v3043_v57 = vld [vmem:[#allocation8 + $0x78] sm:$0xff] }
 0x1be   :  { %3082 = vrsqrt.f32 %v1647_v58  ;;  %vm1666_vm3 = vweird.f32 %v1647_v58  ;;  %2030 = vmatpush.bf16.msrb.mxu1 %v3043_v57 }
 0x1bf   :  { %v1567_v3 = vrot.slane %v1566_v9, 2  ;;  %v1602_v4 = vadd.f32 %v1601_v59, %v1600_v29  ;;  %v1659_v5 = vsel %vm1658_vm1, %v3081_v27, %v1655_v60  ;;  %v3035_v29 = vld [vmem:[#allocation8 + $0x38] sm:$0xff] }
 0x1c0   :  { %v1699_v6 = vmul.f32 %v1691_v28, %v1659_v5  ;;  %v3051_v28 = vld [vmem:[#allocation8 + $0xb8] sm:$0xff]  ;;  %2016 = vmatpush.bf16.msrb.mxu0 %v3035_v29  ;;  %v3054_v29 = vld [vmem:[#allocation8 + $0xd0] sm:$0xff] }
 0x1c1   :  { %v1568_v8 = vadd.f32 %v1567_v3, %v1566_v9  ;;  %v1603_v23 = vrot.slane %v1602_v4, 2  ;;  %v3059_v9 = vld [vmem:[#allocation8 + $0xf8] sm:$0xff]  ;;  %2044 = vmatpush.bf16.msrb.mxu2 %v3051_v28 }
 0x1c2   :  { %v1703_v10 = vmul.f32 %v1699_v6, %v3490_v36  ;;  %v1719_v2 = vperm.slane %v1699_v6, 7  ;;  %2058 = vmatpush.bf16.msrb.mxu3 %v3059_v9  ;;  %v3034_v6 = vld [vmem:[#allocation8 + $0x30] sm:$0xff]  ;;  %v3045_v9 = vld [vmem:[#allocation8 + $0x88] sm:$0xff] }
 0x1c3   :  { %v1569_v46 = vrot.slane %v1568_v8, 1  ;;  %v1604_v11 = vadd.f32 %v1603_v23, %v1602_v4  ;;  %v1503_v13 = vpop.f32.mrf.mxu0  ;;  %v1517_v14 = vpop.f32.mrf.mxu1  ;;  %v3050_v23 = vld [vmem:[#allocation8 + $0xb0] sm:$0xff] }
 0x1c4   :  { %v3083_v17 = vpop.eup %3082  ;;  %1711 = vst [vmem:[#allocation1] sm:$0xff] %v1703_v10  ;;  %v3519_v18 = vmul.f32 %v1719_v2, %v3475_v35  ;;  %v3522_v26 = vmul.f32 %v1719_v2, %v3473_v33  ;;  %v1518_v20 = vadd.f32 %v1517_v14, %v1503_v13  ;;  %v1692_v33 = vperm.slane %v3513_v62, 1  ;;  %v3058_v10 = vld [vmem:[#allocation8 + $0xf0] sm:$0xff]  ;;  %2017 = vmatpush.bf16.msrb.mxu0 %v3034_v6 }
 0x1c5   :  { %v1570_v19 = vadd.f32 %v1569_v46, %v1568_v8  ;;  %v1605_v25 = vrot.slane %v1604_v11, 1  ;;  %v1661_v61 = vmul.f32 %v3083_v17, %v1647_v58  ;;  %vm1667_vm2 = vweird.f32 %v3083_v17  ;;  %v3042_v8 = vld [vmem:[#allocation8 + $0x70] sm:$0xff]  ;;  %2045 = vmatpush.bf16.msrb.mxu2 %v3050_v23 }
 0x1c6   :  { %vm1668_vm4 = vmor %vm1666_vm3, %vm1667_vm2  ;;  %2031 = vmatpush.bf16.msrb.mxu1 %v3042_v8  ;;  %2059 = vmatpush.bf16.msrb.mxu3 %v3058_v10 }
 0x1c7   :  { %v1606_v63 = vadd.f32 %v1605_v25, %v1604_v11  ;;  %v1620_v36 = vsub.f32 %v1570_v19, %v1616_v16  ;;  %v1662_v31 = vmul.f32 %v3083_v17, %v1661_v61  ;;  %v3041_v19 = vld [vmem:[#allocation8 + $0x68] sm:$0xff]  ;;  %v1693_v61 = vperm.slane %v3513_v62, 2 }
 0x1c8   :  { %v3049_v25 = vld [vmem:[#allocation8 + $0xa8] sm:$0xff] }
 0x1c9   :  { %v1628_v43 = vsub.f32 %v1606_v63, %v1624_v30  ;;  %v3524_v32 = vmul.f32 0.125, %v1620_v36  ;;  %v1663_v24 = vmul.f32 0.5, %v1662_v31  ;;  %v3057_v63 = vld [vmem:[#allocation8 + $0xe8] sm:$0xff]  ;;  %2046 = vmatpush.bf16.msrb.mxu2 %v3049_v25 }
 0x1ca   :  { %v1531_v22 = vpop.f32.mrf.mxu2  ;;  %v1545_v45 = vpop.f32.mrf.mxu3  ;;  %2032 = vmatpush.bf16.msrb.mxu1 %v3041_v19  ;;  %2060 = vmatpush.bf16.msrb.mxu3 %v3057_v63 }
 0x1cb   :  { %v1636_v15 = vmul.f32 0.125, %v1628_v43  ;;  %v1640_v35 = vmul.f32 %v3524_v32, %v3524_v32  ;;  %v1664_v34 = vsub.f32 1.5, %v1663_v24  ;;  %v1505_v27 = vpop.f32.mrf.mxu0  ;;  %v1519_v37 = vpop.f32.mrf.mxu1  ;;  %v1532_v39 = vadd.f32 %v1531_v22, %v1518_v20 }
 0x1cc   :  { %v1520_v44 = vadd.f32 %v1519_v37, %v1505_v27 }
 0x1cd   :  { %v1644_v21 = vsub.f32 %v1636_v15, %v1640_v35  ;;  %v1665_v38 = vmul.f32 %v3083_v17, %v1664_v34  ;;  %v3531_v50 = vadd.f32 %v1545_v45, %v1532_v39  ;;  %v3032_v15 = vld [vmem:[#allocation8 + $0x20] sm:$0xff]  ;;  %v3039_v39 = vld [vmem:[#allocation8 + $0x58] sm:$0xff] }
 0x1ce   :  { %v3040_v35 = vld [vmem:[#allocation8 + $0x60] sm:$0xff] }
 0x1cf   :  { %v1648_v41 = vadd.f32 1e-05, %v1644_v21  ;;  %v1669_v42 = vsel %vm1668_vm4, %v3083_v17, %v1665_v38  ;;  %v1581_v55 = vmul.f32 %v3531_v50, %v3531_v50  ;;  %v3033_v17 = vld [vmem:[#allocation8 + $0x28] sm:$0xff]  ;;  %v3048_v34 = vld [vmem:[#allocation8 + $0xa0] sm:$0xff]  ;;  %2033 = vmatpush.bf16.msrb.mxu1 %v3040_v35  ;;  %v3031_v38 = vld [vmem:[#allocation8 + $0x18] sm:$0xff] }
 0x1d0   :  { %v3529_v47 = vmul.f32 %v1692_v33, %v1669_v42  ;;  %2018 = vmatpush.bf16.msrb.mxu0 %v3033_v17  ;;  %v3056_v33 = vld [vmem:[#allocation8 + $0xe0] sm:$0xff]  ;;  %2047 = vmatpush.bf16.msrb.mxu2 %v3048_v34  ;;  %v3047_v42 = vld [vmem:[#allocation8 + $0x98] sm:$0xff] }
 0x1d1   :  { %3084 = vrsqrt.f32 %v1648_v41  ;;  %vm1676_vm6 = vweird.f32 %v1648_v41  ;;  %2061 = vmatpush.bf16.msrb.mxu3 %v3056_v33  ;;  %v103_v17 = vld [vmem:[#allocation10 + $0x3] ss:$8 sm:$0xf] }
 0x1d2   :  { %v1533_v49 = vpop.f32.mrf.mxu2  ;;  %v1704_v52 = vmul.f32 %v3529_v47, %v3501_v48  ;;  %v1547_v53 = vpop.f32.mrf.mxu3 }
 0x1d3   :  { %v1534_v51 = vadd.f32 %v1533_v49, %v1520_v44  ;;  %v3055_v44 = vld [vmem:[#allocation8 + $0xd8] sm:$0xff]  ;;  %2034 = vmatpush.bf16.msrb.mxu1 %v3039_v39 }
 0x1d4   :  { %1712 = vst [vmem:[#allocation1 + $0x9] sm:$0xff] %v1704_v52  ;;  %2019 = vmatpush.bf16.msrb.mxu0 %v3032_v15  ;;  %2048 = vmatpush.bf16.msrb.mxu2 %v3047_v42 }
 0x1d5   :  { %v3535_v54 = vadd.f32 %v1547_v53, %v1534_v51  ;;  %2062 = vmatpush.bf16.msrb.mxu3 %v3055_v44 }
 0x1d7   :  { %v1571_v0 = vadd.f32 %v3535_v54, %v3531_v50  ;;  %v1585_v56 = vmul.f32 %v3535_v54, %v3535_v54  ;;  %v3085_v58 = vpop.eup %3084  ;;  %v1617_v24 = vmul.f32 8.0, %v3535_v54 }
 0x1d8   :  { %v1671_v59 = vmul.f32 %v3085_v58, %v1648_v41  ;;  %vm1677_vm5 = vweird.f32 %v3085_v58  ;;  %2020 = vmatpush.bf16.msrb.mxu0 %v3031_v38 }
 0x1d9   :  { %v1572_v48 = vrot.slane %v1571_v0, 4  ;;  %v1607_v60 = vadd.f32 %v1585_v56, %v1581_v55  ;;  %vm1678_vm7 = vmor %vm1676_vm6, %vm1677_vm5  ;;  %v1625_v37 = vmul.f32 8.0, %v1585_v56  ;;  %v3030_v55 = vld [vmem:[#allocation8 + $0x10] sm:$0xff]  ;;  %2063 = vmatpush.bf16.msrb.mxu3 %v3054_v29 }
 0x1da   :  { %v1672_v3 = vmul.f32 %v3085_v58, %v1671_v59  ;;  %v3046_v56 = vld [vmem:[#allocation8 + $0x90] sm:$0xff]  ;;  %v3053_v59 = vld [vmem:[#allocation8 + $0xc8] sm:$0xff] }
 0x1db   :  { %v1573_v4 = vadd.f32 %v1572_v48, %v1571_v0  ;;  %v1608_v5 = vrot.slane %v1607_v60, 4  ;;  %v3038_v0 = vld [vmem:[#allocation8 + $0x50] sm:$0xff]  ;;  %2049 = vmatpush.bf16.msrb.mxu2 %v3046_v56  ;;  %v3028_v48 = vld [vmem:[#allocation8] sm:$0xff] }
 0x1dc   :  { %v1673_v2 = vmul.f32 0.5, %v1672_v3  ;;  %2021 = vmatpush.bf16.msrb.mxu0 %v3030_v55  ;;  %2035 = vmatpush.bf16.msrb.mxu1 %v3038_v0  ;;  %v3044_v3 = vld [vmem:[#allocation8 + $0x80] sm:$0xff] }
 0x1dd   :  { %v1574_v46 = vrot.slane %v1573_v4, 2  ;;  %v1609_v11 = vadd.f32 %v1608_v5, %v1607_v60  ;;  %v3036_v60 = vld [vmem:[#allocation8 + $0x40] sm:$0xff]  ;;  %2064 = vmatpush.bf16.msrb.mxu3 %v3053_v59 }
 0x1de   :  { %v1674_v13 = vsub.f32 1.5, %v1673_v2  ;;  %v1694_v2 = vperm.slane %v3513_v62, 3 }
 0x1df   :  { %v1575_v14 = vadd.f32 %v1574_v46, %v1573_v4  ;;  %v1610_v16 = vrot.slane %v1609_v11, 2  ;;  %2050 = vmatpush.bf16.msrb.mxu2 %v3045_v9  ;;  %v3052_v4 = vld [vmem:[#allocation8 + $0xc0] sm:$0xff] }
 0x1e0   :  { %v1675_v36 = vmul.f32 %v3085_v58, %v1674_v13 }
 0x1e1   :  { %v1576_v30 = vrot.slane %v1575_v14, 1  ;;  %v1611_v31 = vadd.f32 %v1610_v16, %v1609_v11  ;;  %2065 = vmatpush.bf16.msrb.mxu3 %v3052_v4  ;;  %v1720_v16 = vperm.slane %v3529_v47, 7 }
 0x1e2   :  { %v1679_v43 = vsel %vm1678_vm7, %v3085_v58, %v1675_v36  ;;  %v3037_v58 = vld [vmem:[#allocation8 + $0x48] sm:$0xff] }
 0x1e3   :  { %v1577_v22 = vadd.f32 %v1576_v30, %v1575_v14  ;;  %v1612_v45 = vrot.slane %v1611_v31, 1  ;;  %v3545_v20 = vmul.f32 %v1693_v61, %v1679_v43  ;;  %2036 = vmatpush.bf16.msrb.mxu1 %v3037_v58  ;;  %2051 = vmatpush.bf16.msrb.mxu2 %v3044_v3  ;;  %v1728_v36 = vmul.f32 %v1720_v16, %v3486_v1 }
 0x1e4   :  { %v1724_v30 = vmul.f32 %v1720_v16, %v3483_v7 }
 0x1e5   :  { %v1613_v21 = vadd.f32 %v1612_v45, %v1611_v31  ;;  %v1621_v27 = vsub.f32 %v1577_v22, %v1617_v24  ;;  %v1705_v41 = vmul.f32 %v3545_v20, %v3524_v32  ;;  %v3029_v32 = vld [vmem:[#allocation8 + $0x8] sm:$0xff]  ;;  %v1721_v19 = vperm.slane %v3545_v20, 7 }
 0x1e6   :  { %2022 = vmatpush.bf16.msrb.mxu0 %v3029_v32 }
 0x1e7   :  { %v1629_v49 = vsub.f32 %v1613_v21, %v1625_v37  ;;  %v1633_v51 = vmul.f32 0.125, %v1621_v27  ;;  %1713 = vst [vmem:[#allocation1 + $0x12] sm:$0xff] %v1705_v41  ;;  %2037 = vmatpush.bf16.msrb.mxu1 %v3036_v60  ;;  %v1729_v45 = vmul.f32 %v1721_v19, %v3503_v40  ;;  %v1725_v47 = vmul.f32 %v1721_v19, %v3499_v12 }
 0x1e9   :  { %v1637_v52 = vmul.f32 0.125, %v1629_v49  ;;  %v1641_v53 = vmul.f32 %v1633_v51, %v1633_v51 }
 0x1ea   :  { %2023 = vmatpush.bf16.msrb.mxu0 %v3028_v48 }
 0x1eb   :  { %v1645_v57 = vsub.f32 %v1637_v52, %v1641_v53 }
 0x1ed   :  { %v1649_v28 = vadd.f32 1e-05, %v1645_v57 }
 0x1ef   :  { %3086 = vrsqrt.f32 %v1649_v28  ;;  %vm1686_vm9 = vweird.f32 %v1649_v28 }
 0x1f5   :  { %v3087_v5 = vpop.eup %3086 }
 0x1f6   :  { %v1681_v6 = vmul.f32 %v3087_v5, %v1649_v28  ;;  %vm1687_vm8 = vweird.f32 %v3087_v5 }
 0x1f7   :  { %vm1688_vm10 = vmor %vm1686_vm9, %vm1687_vm8 }
 0x1f8   :  { %v1682_v8 = vmul.f32 %v3087_v5, %v1681_v6 }
 0x1fa   :  { %v1683_v23 = vmul.f32 0.5, %v1682_v8 }
 0x1fc   :  { %v1684_v10 = vsub.f32 1.5, %v1683_v23 }
 0x1fe   :  { %v1685_v46 = vmul.f32 %v3087_v5, %v1684_v10 }
 0x200   :  { %v1689_v11 = vsel %vm1688_vm10, %v3087_v5, %v1685_v46 }
 0x201   :  { %v1702_v13 = vmul.f32 %v1694_v2, %v1689_v11 }
 0x203   :  { %v1706_v14 = vmul.f32 %v1702_v13, %v1633_v51  ;;  %v1722_v25 = vperm.slane %v1702_v13, 7 }
 0x205   :  { %1714 = vst [vmem:[#allocation1 + $0x1b] sm:$0xff] %v1706_v14  ;;  %v1730_v24 = vmul.f32 %v1722_v25, %v3535_v54  ;;  %v1726_v15 = vmul.f32 %v1722_v25, %v3531_v50 }
 0x20c   :  { %v1716_v61 = vld [vmem:[#allocation1 + $0x7] ss:$9 sm:$0xff] }
 0x20d   :  { %v1718_v63 = vsub.f32 %v103_v17, %v1716_v61 }
 0x20f   :  { %v1732_v62 = vperm.slane %v1718_v63, 0  ;;  %v1733_v31 = vperm.slane %v1718_v63, 1  ;;  %v1734_v43 = vperm.slane %v1718_v63, 2  ;;  %v1735_v22 = vperm.slane %v1718_v63, 3 }
 0x211   :  { %v1740_v35 = vadd.f32 %v1732_v62, %v3522_v26  ;;  %v1744_v34 = vadd.f32 %v1732_v62, %v3519_v18  ;;  %v1741_v20 = vadd.f32 %v1733_v31, %v1724_v30  ;;  %v1745_v1 = vadd.f32 %v1733_v31, %v1728_v36  ;;  %v104_v18 = vld [vmem:[#allocation10 + $0x4] ss:$0 sm:$0xff] }
 0x212   :  { %v1742_v33 = vadd.f32 %v1734_v43, %v1725_v47  ;;  %v1746_v7 = vadd.f32 %v1734_v43, %v1729_v45  ;;  %v1743_v21 = vadd.f32 %v1735_v22, %v1726_v15  ;;  %v1747_v27 = vadd.f32 %v1735_v22, %v1730_v24 }
 0x213   :  { %v1748_v37 = vmax.f32 %v1740_v35, 0.0  ;;  %v1752_v38 = vmax.f32 %v1744_v34, 0.0  ;;  %v1749_v39 = vmax.f32 %v1741_v20, 0.0  ;;  %v1753_v40 = vmax.f32 %v1745_v1, 0.0 }
 0x214   :  { %v1750_v41 = vmax.f32 %v1742_v33, 0.0  ;;  %v1754_v54 = vmax.f32 %v1746_v7, 0.0  ;;  %v1751_v42 = vmax.f32 %v1743_v21, 0.0  ;;  %v1755_v12 = vmax.f32 %v1747_v27, 0.0 }
 0x215   :  { %v1756_v44 = vpack.c.bf16 %v1752_v38, %v1748_v37  ;;  %v1757_v50 = vpack.c.bf16 %v1753_v40, %v1749_v39 }
 0x216   :  { %v1758_v49 = vpack.c.bf16 %v1754_v54, %v1750_v41  ;;  %v1759_v26 = vpack.c.bf16 %v1755_v12, %v1751_v42 }
 0x217   :  { %2024 = vmatmul.bf16.vlgmr.msrb.gmra.mxu0 %v1756_v44  ;;  %2038 = vmatmul.bf16.vlgmr.msrb.gmra.mxu1 %v1757_v50 }
 0x218   :  { %2052 = vmatmul.bf16.vlgmr.msrb.gmra.mxu2 %v1758_v49  ;;  %2066 = vmatmul.bf16.vlgmr.msrb.gmra.mxu3 %v1759_v26 }
 0x294   :  { %v2025_v51 = vpop.f32.mrf.mxu0  ;;  %v2039_v53 = vpop.f32.mrf.mxu1 }
 0x295   :  { %v2026_v52 = vadd.f32 %v2025_v51, %v104_v18 }
 0x297   :  { %v2040_v55 = vadd.f32 %v2039_v53, %v2026_v52 }
 0x29b   :  { %v2053_v0 = vpop.f32.mrf.mxu2  ;;  %v2067_v56 = vpop.f32.mrf.mxu3 }
 0x29c   :  { %v2054_v29 = vadd.f32 %v2053_v0, %v2040_v55  ;;  %v2027_v57 = vpop.f32.mrf.mxu0  ;;  %v2041_v58 = vpop.f32.mrf.mxu1 }
 0x29d   :  { %v2028_v32 = vadd.f32 %v2027_v57, %v104_v18 }
 0x29e   :  { %v2068_v28 = vadd.f32 %v2067_v56, %v2054_v29 }
 0x29f   :  { %v2042_v9 = vadd.f32 %v2041_v58, %v2028_v32 }
 0x2a0   :  { %2072 = vst [vmem:[#allocation11] sm:$0xff] %v2068_v28 }
 0x2a3   :  { %v2055_v59 = vpop.f32.mrf.mxu2  ;;  %v2069_v60 = vpop.f32.mrf.mxu3 }
 0x2a4   :  { %v2056_v48 = vadd.f32 %v2055_v59, %v2042_v9 }
 0x2a6   :  { %v2070_v3 = vadd.f32 %v2069_v60, %v2056_v48 }
 0x2a8   :  { %2073 = vst [vmem:[#allocation11 + $0x8] sm:$0xff] %v2070_v3 }
 0x2a9   :  { %2086 = dma.vmem_to_hbm [thread:$0]  %s2079_s4, 256, %s2081_s21, [#allocation4], %s3250_s22, %s3250_s22, %s3251_s23  }
 0x2aa   :  { %3238 = dma.done.wait [#allocation4], 256  }
 0x2ab   :  { %3239 = vsyncadd [#allocation4], 4294967040 }
 0x2ac   :  { %2091 = vsyncpa [#allocation3], 1 }
 0x2ad   :  { %2092 = vsyncpa [#allocation6], 1 }
 0x2ae   :  { %2093 = vsyncpa [#allocation9], 1 }
 0x2af   :  { %2094 = vsyncpa [#allocation4], 1 }

</bundles_post_ra>
